<compile_context>
chip_gen: v6e
topology: v6e:2x2x1
jax: 0.10.0
libtpu: 0.0.40
codegen_flags: <defaults>
</compile_context>

<pallas_src>
import functools

import jax
import jax.numpy as jnp
from jax.experimental import pallas as pl
from jax.experimental.pallas import tpu as pltpu


def window_attention_kernel(x_ref, wqkv_ref, bqkv_ref, bias_ref,
                            out_ref, attn_ref, *, num_heads, win_len, scale,
                            exact_recip):
    # x_ref:    (BW*L, C)      BW windows per grid step, pre-flattened rows
    # wqkv_ref: (C, 3C)        qkv weight (transposed for x @ W)
    # bqkv_ref: (1, 3C)        qkv bias
    # bias_ref: (H, L, L)      relative position bias (pre-gathered)
    # out_ref:  (BW, L*C)      lane-dense flattened attention output
    # attn_ref: (BW, H*L*L)    lane-dense flattened post-softmax attention
    ML, C = x_ref.shape
    L = win_len
    BW = ML // L
    H = num_heads
    d = C // H

    # One large QKV matmul for the whole window batch: (BW*L, C) @ (C, 3C).
    qkv = jnp.dot(x_ref[...], wqkv_ref[...],
                  preferred_element_type=jnp.float32) + bqkv_ref[...]

    bias = bias_ref[...]                                          # (H, L, L)

    outs = []
    attns = []
    # Static loop over heads (H is small); each head's matmuls are batched
    # over the BW windows in a single 3-D (single-batch-dim) einsum.
    for h in range(H):
        qh = qkv[:, h * d:(h + 1) * d].reshape(BW, L, d)
        kh = qkv[:, C + h * d:C + (h + 1) * d].reshape(BW, L, d)
        vh = qkv[:, 2 * C + h * d:2 * C + (h + 1) * d].reshape(BW, L, d)

        # Contract over d directly (no kh transpose).
        s = jnp.einsum('bld,bmd->blm', qh, kh,
                       preferred_element_type=jnp.float32)        # (BW, L, L)
        s = s * scale + bias[h][None]
        s = s - jnp.max(s, axis=-1, keepdims=True)
        p = jnp.exp(s)
        denom = jnp.sum(p, axis=-1, keepdims=True)                # >= 1.0
        if exact_recip:
            inv = pl.reciprocal(denom, approx=False)
        else:
            # EUP approximate reciprocal + one Newton step -> f32-accurate.
            inv = pl.reciprocal(denom, approx=True)
            inv = inv * (2.0 - denom * inv)
        p = p * inv
        # attn_drop(p=0.0) -> identity.

        o = jnp.einsum('blm,bmd->bld', p, vh,
                       preferred_element_type=jnp.float32)        # (BW, L, d)

        attns.append(p.reshape(BW, L * L))   # head h occupies lanes [h*L*L, ...)
        outs.append(o)

    # Single consolidated, lane-dense full-block stores (unmasked vst).
    attn_ref[...] = jnp.concatenate(attns, axis=-1).astype(attn_ref.dtype)
    out_ref[...] = (jnp.concatenate(outs, axis=-1)      # (BW, L, C), head-interleaved
                    .reshape(BW, L * C).astype(out_ref.dtype))
    # NOTE: reference computes self.proj(x)/self.proj_drop(x) but discards the
    # result, so no projection matmul contributes to the returned tensors.


def _device_kind() -> str:
    try:
        return jax.devices()[0].device_kind.lower()
    except Exception:
        return ""


def window_attention(x, w_qkv, b_qkv, rel_bias, num_heads, *, bw_tile=None):
    Bw, L, C = x.shape
    H = num_heads
    d = C // H
    scale = d ** (-0.5)

    kind = _device_kind()
    # Single-TC chips (v5e "v5 lite", v6e, and per-core devices v2/v3): one
    # grid step.  Multi-TC chips (v4/v5p megacore, v7x): an even 2-step
    # "parallel" grid so both TensorCores get work.
    single_tc = (kind == "") or ("lite" in kind) or any(
        t in kind for t in ("v2", "v3", "v5e", "v6e", "v6 "))
    # Approx reciprocal + Newton on modern chips; exact divide otherwise.
    exact_recip = (kind == "") or ("v2" in kind) or ("v3" in kind)

    if bw_tile is None:
        n_steps = 1 if single_tc else min(2, Bw)
        bw_tile = max(1, pl.cdiv(Bw, n_steps))
        # Cap so double-buffered (x, out, attn) blocks stay well under the
        # default scoped-VMEM limit.  For real Swin shapes on v7x (64 MiB
        # VMEM) also set CompilerParams(vmem_limit_bytes=...) explicitly.
        bw_tile = min(bw_tile, 512)
    grid_len = pl.cdiv(Bw, bw_tile)
    bw_pad = grid_len * bw_tile
    if bw_pad != Bw:
        x = jnp.pad(x, ((0, bw_pad - Bw), (0, 0), (0, 0)))

    # Present x pre-flattened as (Bw*L, C): free reshape in HBM, clean 2-D
    # 8-aligned sublane tile for the QKV matmul, no in-kernel reshape.
    x2d = x.reshape(bw_pad * L, C)

    kern = functools.partial(window_attention_kernel, num_heads=H, win_len=L,
                             scale=scale, exact_recip=exact_recip)

    # Lane-dense flattened output shapes (last dims are multiples of 128 for
    # any realistic L/C/H); reshaped back to logical shapes below.
    out_shapes = (
        jax.ShapeDtypeStruct((bw_pad, L * C), jnp.float32),
        jax.ShapeDtypeStruct((bw_pad, H * L * L), jnp.float32),
    )
    out, attn = pl.pallas_call(
        kern,
        out_shape=out_shapes,
        grid=(grid_len,),
        in_specs=[
            pl.BlockSpec((bw_tile * L, C), lambda b: (b, 0)),
            pl.BlockSpec((C, 3 * C), lambda b: (0, 0)),
            pl.BlockSpec((1, 3 * C), lambda b: (0, 0)),
            pl.BlockSpec((H, L, L), lambda b: (0, 0, 0)),
        ],
        out_specs=(
            pl.BlockSpec((bw_tile, L * C), lambda b: (b, 0)),
            pl.BlockSpec((bw_tile, H * L * L), lambda b: (b, 0)),
        ),
        compiler_params=pltpu.CompilerParams(
            dimension_semantics=("parallel",)),
    )(x2d, w_qkv, b_qkv.reshape(1, -1), rel_bias)

    # Free reshapes in HBM back to the module's logical layouts.
    out = out.reshape(bw_pad, L, C)
    attn = attn.reshape(bw_pad, H, L, L)
    if bw_pad != Bw:
        out = out[:Bw]
        attn = attn[:Bw]
    return out, attn


def reference_forward(x, w_qkv, b_qkv, rel_bias, num_heads):
    """Pure-JAX replica of the PyTorch forward (for validation)."""
    Bw, L, C = x.shape
    H = num_heads
    d = C // H
    scale = d ** (-0.5)
    qkv = (x @ w_qkv + b_qkv).reshape(Bw, L, 3, H, d).transpose(2, 0, 3, 1, 4)
    q, k, v = qkv[0] * scale, qkv[1], qkv[2]
    attn = q @ jnp.swapaxes(k, -2, -1) + rel_bias[None]
    attn = jax.nn.softmax(attn, axis=-1)
    out = (attn @ v).transpose(0, 2, 1, 3).reshape(Bw, L, C)
    return out, attn


if __name__ == "__main__":
    # Small config consistent with the module: L (= N) equals window_size
    # because relative_position_index is (window_size, window_size).
    hidden_dim = 32
    window_size = 8
    num_heads = 4
    Bw = 16                     # num_windows * B
    L = window_size
    C = hidden_dim

    key = jax.random.PRNGKey(0)
    kx, kw, kb, kt = jax.random.split(key, 4)

    x = jax.random.normal(kx, (Bw, L, C), dtype=jnp.float32)

    # Deterministic synthetic parameters (shapes match nn.Linear / the table).
    w_qkv = jax.random.normal(kw, (C, 3 * C), dtype=jnp.float32) * 0.05
    b_qkv = jax.random.normal(kb, (3 * C,), dtype=jnp.float32) * 0.01
    rel_table = (jax.random.truncated_normal(
        kt, -2.0, 2.0, (2 * window_size - 1, num_heads), dtype=jnp.float32)
        * 0.02)

    # Gather relative position bias (parameter setup glue, plain JAX):
    coords = jnp.arange(window_size)
    rel_idx = coords[:, None] - coords[None, :] + window_size - 1   # (ws, ws)
    rel_bias = rel_table[rel_idx.reshape(-1)].reshape(
        window_size, window_size, num_heads).transpose(2, 0, 1)     # (H, L, L)

    out, attn = window_attention(x, w_qkv, b_qkv, rel_bias, num_heads)
    out = jax.block_until_ready(out)
    attn = jax.block_until_ready(attn)

    ref_out, ref_attn = reference_forward(x, w_qkv, b_qkv, rel_bias, num_heads)
    assert jnp.allclose(out, ref_out, atol=1e-5, rtol=1e-5)
    assert jnp.allclose(attn, ref_attn, atol=1e-5, rtol=1e-5)

    print("KERNEL_OK")
</pallas_src>

<mosaic_0001>
module attributes {stable_mosaic.version = 11 : i64} {
  func.func @window_attention_kernel(%arg0: i32, %arg1: memref<64x32xf32, #tpu.memory_space<vmem>>, %arg2: memref<32x96xf32, #tpu.memory_space<vmem>>, %arg3: memref<1x96xf32, #tpu.memory_space<vmem>>, %arg4: memref<4x8x8xf32, #tpu.memory_space<vmem>>, %arg5: memref<8x256xf32, #tpu.memory_space<vmem>>, %arg6: memref<8x256xf32, #tpu.memory_space<vmem>>) attributes {dimension_semantics = [#tpu.dimension_semantics<parallel>], iteration_bounds = array<i64: 2>, scalar_prefetch = 0 : i64, scratch_operands = 0 : i64, tpu.core_type = #tpu.core_type<tc>, window_params = [{transform_indices = @transform_0, window_bounds = array<i64: 64, 32>}, {pipeline_mode = #tpu.pipeline_mode<synchronous>, transform_indices = @transform_1, window_bounds = array<i64: 32, 96>}, {pipeline_mode = #tpu.pipeline_mode<synchronous>, transform_indices = @transform_2, window_bounds = array<i64: 1, 96>}, {pipeline_mode = #tpu.pipeline_mode<synchronous>, transform_indices = @transform_3, window_bounds = array<i64: 4, 8, 8>}, {transform_indices = @transform_4, window_bounds = array<i64: 8, 256>}, {transform_indices = @transform_5, window_bounds = array<i64: 8, 256>}]} {
    %c0 = arith.constant 0 : index
    %c0_0 = arith.constant 0 : index
    %0 = vector.load %arg1[%c0, %c0_0] : memref<64x32xf32, #tpu.memory_space<vmem>>, vector<64x32xf32>
    %c0_1 = arith.constant 0 : index
    %c0_2 = arith.constant 0 : index
    %1 = vector.load %arg2[%c0_1, %c0_2] : memref<32x96xf32, #tpu.memory_space<vmem>>, vector<32x96xf32>
    %cst = arith.constant dense<0.000000e+00> : vector<64x96xf32>
    %2 = tpu.matmul %0, %1, %cst {dimension_numbers = #tpu.dot_dimension_numbers<[1], [0], [0], [1], [0, 0, 1, 1], [], []>} : vector<64x32xf32>, vector<32x96xf32>, vector<64x96xf32> -> vector<64x96xf32>
    %c0_3 = arith.constant 0 : index
    %c0_4 = arith.constant 0 : index
    %3 = vector.load %arg3[%c0_3, %c0_4] : memref<1x96xf32, #tpu.memory_space<vmem>>, vector<1x96xf32>
    %4 = vector.broadcast %3 : vector<1x96xf32> to vector<64x96xf32>
    %5 = arith.addf %2, %4 : vector<64x96xf32>
    %c0_5 = arith.constant 0 : index
    %c0_6 = arith.constant 0 : index
    %c0_7 = arith.constant 0 : index
    %6 = vector.load %arg4[%c0_5, %c0_6, %c0_7] : memref<4x8x8xf32, #tpu.memory_space<vmem>>, vector<4x8x8xf32>
    %7 = vector.extract_strided_slice %5 {offsets = [0, 0], sizes = [64, 8], strides = [1, 1]} : vector<64x96xf32> to vector<64x8xf32>
    %8 = vector.shape_cast %7 : vector<64x8xf32> to vector<8x8x8xf32>
    %9 = vector.extract_strided_slice %5 {offsets = [0, 32], sizes = [64, 8], strides = [1, 1]} : vector<64x96xf32> to vector<64x8xf32>
    %10 = vector.shape_cast %9 : vector<64x8xf32> to vector<8x8x8xf32>
    %11 = vector.extract_strided_slice %5 {offsets = [0, 64], sizes = [64, 8], strides = [1, 1]} : vector<64x96xf32> to vector<64x8xf32>
    %12 = vector.shape_cast %11 : vector<64x8xf32> to vector<8x8x8xf32>
    "tpu.trace_start"() <{level = 10 : i32, message = "bld,bmd->blm"}> : () -> ()
    %cst_8 = arith.constant dense<0.000000e+00> : vector<8x8x8xf32>
    %13 = tpu.matmul %8, %10, %cst_8 {dimension_numbers = #tpu.dot_dimension_numbers<[2], [2], [1], [1], [0, 0, 0, 1, 1, 1], [0], [0]>} : vector<8x8x8xf32>, vector<8x8x8xf32>, vector<8x8x8xf32> -> vector<8x8x8xf32>
    "tpu.trace_stop"() : () -> ()
    %cst_9 = arith.constant 0.353553385 : f32
    %14 = vector.broadcast %cst_9 : f32 to vector<8x8x8xf32>
    %15 = arith.mulf %13, %14 : vector<8x8x8xf32>
    %16 = vector.extract_strided_slice %6 {offsets = [0, 0, 0], sizes = [1, 8, 8], strides = [1, 1, 1]} : vector<4x8x8xf32> to vector<1x8x8xf32>
    %17 = vector.shape_cast %16 : vector<1x8x8xf32> to vector<8x8xf32>
    %18 = vector.shape_cast %17 : vector<8x8xf32> to vector<1x8x8xf32>
    %19 = vector.broadcast %18 : vector<1x8x8xf32> to vector<8x8x8xf32>
    %20 = arith.addf %15, %19 : vector<8x8x8xf32>
    %cst_10 = arith.constant dense<0xFF800000> : vector<8x8xf32>
    %21 = vector.multi_reduction <maximumf>, %20, %cst_10 [2] : vector<8x8x8xf32> to vector<8x8xf32>
    %22 = vector.shape_cast %21 : vector<8x8xf32> to vector<8x8x1xf32>
    %23 = vector.broadcast %22 : vector<8x8x1xf32> to vector<8x8x8xf32>
    %24 = arith.subf %20, %23 : vector<8x8x8xf32>
    %25 = math.exp %24 : vector<8x8x8xf32>
    %cst_11 = arith.constant dense<0.000000e+00> : vector<8x8xf32>
    %26 = vector.multi_reduction <add>, %25, %cst_11 [2] : vector<8x8x8xf32> to vector<8x8xf32>
    %27 = vector.shape_cast %26 : vector<8x8xf32> to vector<8x8x1xf32>
    %28 = tpu.reciprocal %27 {approx = true} : vector<8x8x1xf32> -> vector<8x8x1xf32>
    %29 = arith.mulf %27, %28 : vector<8x8x1xf32>
    %cst_12 = arith.constant 2.000000e+00 : f32
    %30 = vector.broadcast %cst_12 : f32 to vector<8x8x1xf32>
    %31 = arith.subf %30, %29 : vector<8x8x1xf32>
    %32 = arith.mulf %28, %31 : vector<8x8x1xf32>
    %33 = vector.broadcast %32 : vector<8x8x1xf32> to vector<8x8x8xf32>
    %34 = arith.mulf %25, %33 : vector<8x8x8xf32>
    "tpu.trace_start"() <{level = 10 : i32, message = "blm,bmd->bld"}> : () -> ()
    %cst_13 = arith.constant dense<0.000000e+00> : vector<8x8x8xf32>
    %35 = tpu.matmul %34, %12, %cst_13 {dimension_numbers = #tpu.dot_dimension_numbers<[2], [1], [1], [2], [0, 0, 0, 1, 1, 2], [0], [0]>} : vector<8x8x8xf32>, vector<8x8x8xf32>, vector<8x8x8xf32> -> vector<8x8x8xf32>
    "tpu.trace_stop"() : () -> ()
    %36 = vector.shape_cast %34 : vector<8x8x8xf32> to vector<8x64xf32>
    %37 = vector.extract_strided_slice %5 {offsets = [0, 8], sizes = [64, 8], strides = [1, 1]} : vector<64x96xf32> to vector<64x8xf32>
    %38 = vector.shape_cast %37 : vector<64x8xf32> to vector<8x8x8xf32>
    %39 = vector.extract_strided_slice %5 {offsets = [0, 40], sizes = [64, 8], strides = [1, 1]} : vector<64x96xf32> to vector<64x8xf32>
    %40 = vector.shape_cast %39 : vector<64x8xf32> to vector<8x8x8xf32>
    %41 = vector.extract_strided_slice %5 {offsets = [0, 72], sizes = [64, 8], strides = [1, 1]} : vector<64x96xf32> to vector<64x8xf32>
    %42 = vector.shape_cast %41 : vector<64x8xf32> to vector<8x8x8xf32>
    "tpu.trace_start"() <{level = 10 : i32, message = "bld,bmd->blm"}> : () -> ()
    %cst_14 = arith.constant dense<0.000000e+00> : vector<8x8x8xf32>
    %43 = tpu.matmul %38, %40, %cst_14 {dimension_numbers = #tpu.dot_dimension_numbers<[2], [2], [1], [1], [0, 0, 0, 1, 1, 1], [0], [0]>} : vector<8x8x8xf32>, vector<8x8x8xf32>, vector<8x8x8xf32> -> vector<8x8x8xf32>
    "tpu.trace_stop"() : () -> ()
    %cst_15 = arith.constant 0.353553385 : f32
    %44 = vector.broadcast %cst_15 : f32 to vector<8x8x8xf32>
    %45 = arith.mulf %43, %44 : vector<8x8x8xf32>
    %46 = vector.extract_strided_slice %6 {offsets = [1, 0, 0], sizes = [1, 8, 8], strides = [1, 1, 1]} : vector<4x8x8xf32> to vector<1x8x8xf32>
    %47 = vector.shape_cast %46 : vector<1x8x8xf32> to vector<8x8xf32>
    %48 = vector.shape_cast %47 : vector<8x8xf32> to vector<1x8x8xf32>
    %49 = vector.broadcast %48 : vector<1x8x8xf32> to vector<8x8x8xf32>
    %50 = arith.addf %45, %49 : vector<8x8x8xf32>
    %cst_16 = arith.constant dense<0xFF800000> : vector<8x8xf32>
    %51 = vector.multi_reduction <maximumf>, %50, %cst_16 [2] : vector<8x8x8xf32> to vector<8x8xf32>
    %52 = vector.shape_cast %51 : vector<8x8xf32> to vector<8x8x1xf32>
    %53 = vector.broadcast %52 : vector<8x8x1xf32> to vector<8x8x8xf32>
    %54 = arith.subf %50, %53 : vector<8x8x8xf32>
    %55 = math.exp %54 : vector<8x8x8xf32>
    %cst_17 = arith.constant dense<0.000000e+00> : vector<8x8xf32>
    %56 = vector.multi_reduction <add>, %55, %cst_17 [2] : vector<8x8x8xf32> to vector<8x8xf32>
    %57 = vector.shape_cast %56 : vector<8x8xf32> to vector<8x8x1xf32>
    %58 = tpu.reciprocal %57 {approx = true} : vector<8x8x1xf32> -> vector<8x8x1xf32>
    %59 = arith.mulf %57, %58 : vector<8x8x1xf32>
    %cst_18 = arith.constant 2.000000e+00 : f32
    %60 = vector.broadcast %cst_18 : f32 to vector<8x8x1xf32>
    %61 = arith.subf %60, %59 : vector<8x8x1xf32>
    %62 = arith.mulf %58, %61 : vector<8x8x1xf32>
    %63 = vector.broadcast %62 : vector<8x8x1xf32> to vector<8x8x8xf32>
    %64 = arith.mulf %55, %63 : vector<8x8x8xf32>
    "tpu.trace_start"() <{level = 10 : i32, message = "blm,bmd->bld"}> : () -> ()
    %cst_19 = arith.constant dense<0.000000e+00> : vector<8x8x8xf32>
    %65 = tpu.matmul %64, %42, %cst_19 {dimension_numbers = #tpu.dot_dimension_numbers<[2], [1], [1], [2], [0, 0, 0, 1, 1, 2], [0], [0]>} : vector<8x8x8xf32>, vector<8x8x8xf32>, vector<8x8x8xf32> -> vector<8x8x8xf32>
    "tpu.trace_stop"() : () -> ()
    %66 = vector.shape_cast %64 : vector<8x8x8xf32> to vector<8x64xf32>
    %67 = vector.extract_strided_slice %5 {offsets = [0, 16], sizes = [64, 8], strides = [1, 1]} : vector<64x96xf32> to vector<64x8xf32>
    %68 = vector.shape_cast %67 : vector<64x8xf32> to vector<8x8x8xf32>
    %69 = vector.extract_strided_slice %5 {offsets = [0, 48], sizes = [64, 8], strides = [1, 1]} : vector<64x96xf32> to vector<64x8xf32>
    %70 = vector.shape_cast %69 : vector<64x8xf32> to vector<8x8x8xf32>
    %71 = vector.extract_strided_slice %5 {offsets = [0, 80], sizes = [64, 8], strides = [1, 1]} : vector<64x96xf32> to vector<64x8xf32>
    %72 = vector.shape_cast %71 : vector<64x8xf32> to vector<8x8x8xf32>
    "tpu.trace_start"() <{level = 10 : i32, message = "bld,bmd->blm"}> : () -> ()
    %cst_20 = arith.constant dense<0.000000e+00> : vector<8x8x8xf32>
    %73 = tpu.matmul %68, %70, %cst_20 {dimension_numbers = #tpu.dot_dimension_numbers<[2], [2], [1], [1], [0, 0, 0, 1, 1, 1], [0], [0]>} : vector<8x8x8xf32>, vector<8x8x8xf32>, vector<8x8x8xf32> -> vector<8x8x8xf32>
    "tpu.trace_stop"() : () -> ()
    %cst_21 = arith.constant 0.353553385 : f32
    %74 = vector.broadcast %cst_21 : f32 to vector<8x8x8xf32>
    %75 = arith.mulf %73, %74 : vector<8x8x8xf32>
    %76 = vector.extract_strided_slice %6 {offsets = [2, 0, 0], sizes = [1, 8, 8], strides = [1, 1, 1]} : vector<4x8x8xf32> to vector<1x8x8xf32>
    %77 = vector.shape_cast %76 : vector<1x8x8xf32> to vector<8x8xf32>
    %78 = vector.shape_cast %77 : vector<8x8xf32> to vector<1x8x8xf32>
    %79 = vector.broadcast %78 : vector<1x8x8xf32> to vector<8x8x8xf32>
    %80 = arith.addf %75, %79 : vector<8x8x8xf32>
    %cst_22 = arith.constant dense<0xFF800000> : vector<8x8xf32>
    %81 = vector.multi_reduction <maximumf>, %80, %cst_22 [2] : vector<8x8x8xf32> to vector<8x8xf32>
    %82 = vector.shape_cast %81 : vector<8x8xf32> to vector<8x8x1xf32>
    %83 = vector.broadcast %82 : vector<8x8x1xf32> to vector<8x8x8xf32>
    %84 = arith.subf %80, %83 : vector<8x8x8xf32>
    %85 = math.exp %84 : vector<8x8x8xf32>
    %cst_23 = arith.constant dense<0.000000e+00> : vector<8x8xf32>
    %86 = vector.multi_reduction <add>, %85, %cst_23 [2] : vector<8x8x8xf32> to vector<8x8xf32>
    %87 = vector.shape_cast %86 : vector<8x8xf32> to vector<8x8x1xf32>
    %88 = tpu.reciprocal %87 {approx = true} : vector<8x8x1xf32> -> vector<8x8x1xf32>
    %89 = arith.mulf %87, %88 : vector<8x8x1xf32>
    %cst_24 = arith.constant 2.000000e+00 : f32
    %90 = vector.broadcast %cst_24 : f32 to vector<8x8x1xf32>
    %91 = arith.subf %90, %89 : vector<8x8x1xf32>
    %92 = arith.mulf %88, %91 : vector<8x8x1xf32>
    %93 = vector.broadcast %92 : vector<8x8x1xf32> to vector<8x8x8xf32>
    %94 = arith.mulf %85, %93 : vector<8x8x8xf32>
    "tpu.trace_start"() <{level = 10 : i32, message = "blm,bmd->bld"}> : () -> ()
    %cst_25 = arith.constant dense<0.000000e+00> : vector<8x8x8xf32>
    %95 = tpu.matmul %94, %72, %cst_25 {dimension_numbers = #tpu.dot_dimension_numbers<[2], [1], [1], [2], [0, 0, 0, 1, 1, 2], [0], [0]>} : vector<8x8x8xf32>, vector<8x8x8xf32>, vector<8x8x8xf32> -> vector<8x8x8xf32>
    "tpu.trace_stop"() : () -> ()
    %96 = vector.shape_cast %94 : vector<8x8x8xf32> to vector<8x64xf32>
    %97 = vector.extract_strided_slice %5 {offsets = [0, 24], sizes = [64, 8], strides = [1, 1]} : vector<64x96xf32> to vector<64x8xf32>
    %98 = vector.shape_cast %97 : vector<64x8xf32> to vector<8x8x8xf32>
    %99 = vector.extract_strided_slice %5 {offsets = [0, 56], sizes = [64, 8], strides = [1, 1]} : vector<64x96xf32> to vector<64x8xf32>
    %100 = vector.shape_cast %99 : vector<64x8xf32> to vector<8x8x8xf32>
    %101 = vector.extract_strided_slice %5 {offsets = [0, 88], sizes = [64, 8], strides = [1, 1]} : vector<64x96xf32> to vector<64x8xf32>
    %102 = vector.shape_cast %101 : vector<64x8xf32> to vector<8x8x8xf32>
    "tpu.trace_start"() <{level = 10 : i32, message = "bld,bmd->blm"}> : () -> ()
    %cst_26 = arith.constant dense<0.000000e+00> : vector<8x8x8xf32>
    %103 = tpu.matmul %98, %100, %cst_26 {dimension_numbers = #tpu.dot_dimension_numbers<[2], [2], [1], [1], [0, 0, 0, 1, 1, 1], [0], [0]>} : vector<8x8x8xf32>, vector<8x8x8xf32>, vector<8x8x8xf32> -> vector<8x8x8xf32>
    "tpu.trace_stop"() : () -> ()
    %cst_27 = arith.constant 0.353553385 : f32
    %104 = vector.broadcast %cst_27 : f32 to vector<8x8x8xf32>
    %105 = arith.mulf %103, %104 : vector<8x8x8xf32>
    %106 = vector.extract_strided_slice %6 {offsets = [3, 0, 0], sizes = [1, 8, 8], strides = [1, 1, 1]} : vector<4x8x8xf32> to vector<1x8x8xf32>
    %107 = vector.shape_cast %106 : vector<1x8x8xf32> to vector<8x8xf32>
    %108 = vector.shape_cast %107 : vector<8x8xf32> to vector<1x8x8xf32>
    %109 = vector.broadcast %108 : vector<1x8x8xf32> to vector<8x8x8xf32>
    %110 = arith.addf %105, %109 : vector<8x8x8xf32>
    %cst_28 = arith.constant dense<0xFF800000> : vector<8x8xf32>
    %111 = vector.multi_reduction <maximumf>, %110, %cst_28 [2] : vector<8x8x8xf32> to vector<8x8xf32>
    %112 = vector.shape_cast %111 : vector<8x8xf32> to vector<8x8x1xf32>
    %113 = vector.broadcast %112 : vector<8x8x1xf32> to vector<8x8x8xf32>
    %114 = arith.subf %110, %113 : vector<8x8x8xf32>
    %115 = math.exp %114 : vector<8x8x8xf32>
    %cst_29 = arith.constant dense<0.000000e+00> : vector<8x8xf32>
    %116 = vector.multi_reduction <add>, %115, %cst_29 [2] : vector<8x8x8xf32> to vector<8x8xf32>
    %117 = vector.shape_cast %116 : vector<8x8xf32> to vector<8x8x1xf32>
    %118 = tpu.reciprocal %117 {approx = true} : vector<8x8x1xf32> -> vector<8x8x1xf32>
    %119 = arith.mulf %117, %118 : vector<8x8x1xf32>
    %cst_30 = arith.constant 2.000000e+00 : f32
    %120 = vector.broadcast %cst_30 : f32 to vector<8x8x1xf32>
    %121 = arith.subf %120, %119 : vector<8x8x1xf32>
    %122 = arith.mulf %118, %121 : vector<8x8x1xf32>
    %123 = vector.broadcast %122 : vector<8x8x1xf32> to vector<8x8x8xf32>
    %124 = arith.mulf %115, %123 : vector<8x8x8xf32>
    "tpu.trace_start"() <{level = 10 : i32, message = "blm,bmd->bld"}> : () -> ()
    %cst_31 = arith.constant dense<0.000000e+00> : vector<8x8x8xf32>
    %125 = tpu.matmul %124, %102, %cst_31 {dimension_numbers = #tpu.dot_dimension_numbers<[2], [1], [1], [2], [0, 0, 0, 1, 1, 2], [0], [0]>} : vector<8x8x8xf32>, vector<8x8x8xf32>, vector<8x8x8xf32> -> vector<8x8x8xf32>
    "tpu.trace_stop"() : () -> ()
    %126 = vector.shape_cast %124 : vector<8x8x8xf32> to vector<8x64xf32>
    %127 = tpu.concatenate %36, %66, %96, %126 in 1 : vector<8x64xf32>, vector<8x64xf32>, vector<8x64xf32>, vector<8x64xf32> -> vector<8x256xf32>
    %c0_32 = arith.constant 0 : index
    %c0_33 = arith.constant 0 : index
    %128 = vector.load %arg6[%c0_32, %c0_33] : memref<8x256xf32, #tpu.memory_space<vmem>>, vector<8x256xf32>
    tpu.vector_store %arg6[%c0_32, %c0_33], %127 {strides = array<i32>} : memref<8x256xf32, #tpu.memory_space<vmem>>, vector<8x256xf32>,
    %129 = tpu.concatenate %35, %65, %95, %125 in 2 : vector<8x8x8xf32>, vector<8x8x8xf32>, vector<8x8x8xf32>, vector<8x8x8xf32> -> vector<8x8x32xf32>
    %130 = vector.shape_cast %129 : vector<8x8x32xf32> to vector<8x256xf32>
    %c0_34 = arith.constant 0 : index
    %c0_35 = arith.constant 0 : index
    %131 = vector.load %arg5[%c0_34, %c0_35] : memref<8x256xf32, #tpu.memory_space<vmem>>, vector<8x256xf32>
    tpu.vector_store %arg5[%c0_34, %c0_35], %130 {strides = array<i32>} : memref<8x256xf32, #tpu.memory_space<vmem>>, vector<8x256xf32>,
    return
  }
  func.func @transform_0(%arg0: i32) -> (i32, i32) {
    %c0_i32 = arith.constant 0 : i32
    %c0_i32_0 = arith.constant 0 : i32
    return %arg0, %c0_i32 : i32, i32
  }
  func.func @transform_1(%arg0: i32) -> (i32, i32) {
    %c0_i32 = arith.constant 0 : i32
    %c0_i32_0 = arith.constant 0 : i32
    %c0_i32_1 = arith.constant 0 : i32
    return %c0_i32, %c0_i32_0 : i32, i32
  }
  func.func @transform_2(%arg0: i32) -> (i32, i32) {
    %c0_i32 = arith.constant 0 : i32
    %c0_i32_0 = arith.constant 0 : i32
    %c0_i32_1 = arith.constant 0 : i32
    return %c0_i32, %c0_i32_0 : i32, i32
  }
  func.func @transform_3(%arg0: i32) -> (i32, i32, i32) {
    %c0_i32 = arith.constant 0 : i32
    %c0_i32_0 = arith.constant 0 : i32
    %c0_i32_1 = arith.constant 0 : i32
    %c0_i32_2 = arith.constant 0 : i32
    return %c0_i32, %c0_i32_0, %c0_i32_1 : i32, i32, i32
  }
  func.func @transform_4(%arg0: i32) -> (i32, i32) {
    %c0_i32 = arith.constant 0 : i32
    %c0_i32_0 = arith.constant 0 : i32
    return %arg0, %c0_i32 : i32, i32
  }
  func.func @transform_5(%arg0: i32) -> (i32, i32) {
    %c0_i32 = arith.constant 0 : i32
    %c0_i32_0 = arith.constant 0 : i32
    return %arg0, %c0_i32 : i32, i32
  }
}

</mosaic_0001>

<bundles_post_ra>
// kernel: tpu_custom_call.1
= control target key start
LH: loop header
LB: loop body
LE: loop exit
PB: predicated region body
PF: predicated region fallthrough
CT: control target
= control target key end

     0   :  { %11 = vsyncpa [#allocation3], 0  ;;  %s9357_s0 = inlined_call_operand.vmem [shape: f32[128,32], index: 0, kind: input, shape index: {}]   ;;  %s9358_s1 = inlined_call_operand.vmem [shape: f32[32,96], index: 1, kind: input, shape index: {}]   ;;  %s9359_s2 = inlined_call_operand.vmem [shape: f32[1,96], index: 2, kind: input, shape index: {}]   ;;  %s9360_s3 = inlined_call_operand.vmem [shape: f32[4,8,8], index: 3, kind: input, shape index: {}]   ;;  %s9361_s4 = inlined_call_operand.hbm [shape: f32[16,256], index: 4, kind: output, shape index: {0}]   ;;  %s9362_s5 = inlined_call_operand.hbm [shape: f32[16,256], index: 5, kind: output, shape index: {1}]  }
   0x1   :  { %13 = vsyncpa [#allocation3 + $0x1], 0 }
   0x2   :  { %14 = vsyncpa [#allocation5], 0 }
   0x3   :  { %16 = vsyncpa [#allocation5 + $0x1], 0  ;;  %s7875_s18 = smov 0   ;;  %s7877_s19 = smov 0  }
   0x4   :  { %s7879_s20 = smov 0   ;;  %s7881_s21 = smov 0  }
   0x5 LB: > { %s7896_s22 = sadd.s32 4294967295, %s7822_s21   ;;  %s6938_s23 = sadd.s32 4294967294, %s7822_s21   ;;  %s7822_s21 = sphi %s7881_s21, %s9456_s21   ;;  %s7818_s20 = sphi %s7879_s20, %s9455_s20   ;;  %s7814_s19 = sphi %s7877_s19, %s9454_s19   ;;  %s7810_s18 = sphi %s7875_s18, %s9453_s18  }
   0x6   : > { %s7900_s24 = sadd.s32 1, %s7822_s21   ;;  %s118_s25 = sadd.s32 1, %s7818_s20 }
   0x7   : > { %s115_s26 = ssub.s32 %s7822_s21, %s7900_s24  ;;  %p128_p0 = scmp.ne.s32.totalorder %s7818_s20, %s7814_s19 }
   0x8   : > { %p116_p1 = scmp.eq.s32.totalorder %s115_s26, 0  ;;  %p129_p2 = scmp.eq.s32.totalorder %s7896_s22, 1 }
   0x9   : > { %p134_p3 = scmp.ne.s32.totalorder %s7814_s19, %s7810_s18  ;;  %p135_p4 = scmp.eq.s32.totalorder %s6938_s23, 1 }
   0xa   : > { %s7911_s27 = scalar_select %p116_p1, %s7818_s20, %s118_s25  }
   0xb   : > { %p7913_p5 = por %p129_p2, %p128_p0  ;;  %p7917_p6 = por %p135_p4, %p134_p3 }
   0xc   : > { %p6941_p7 = scmp.ge.s32.totalorder %s7822_s21, 1  ;;  %p197_p8 = scmp.lt.s32.totalorder %s7822_s21, 3 }
   0xe   : > { %p198_p9 = pnand %p6941_p7, %p197_p8 }
  0x10   : > { %201 = sbr.rel (%p198_p9) target bundleno = 3007 (0xbbf), region = 36 }
  0x15   : > { %v247_v0 = vld [vmem:[%s9358_s1 + $0x18] sm:$0xff]  ;;  %v246_v1 = vld [vmem:[%s9358_s1 + $0x10] sm:$0xff]  ;;  %s6944_s9 = sshll.u32 %s7896_s22, 3  ;;  %v245_v2 = vld [vmem:[%s9358_s1 + $0x8] sm:$0xff]  ;;  %vm255_vm0 = vcmask 261120   ;;  %v9363_v12 = vmov 0.0  }
  0x16   : > { %7201 = vmatprep.subr.mxu0 %v247_v0  ;;  %p231_p10 = scmp.lt.s32.totalorder %s6944_s9, 15  ;;  %v244_v3 = vld [vmem:[%s9358_s1] sm:$0xff]  ;;  %7221 = vmatprep.subr.mxu1 %v9363_v12  ;;  %vm7825_vm1 = vmmov 0   ;;  %s7826_s26 = smov 96   ;;  %vm392_vm2 = vcmask 64512   ;;  %vm1907_vm3 = vcmask 130048  }
  0x17   : > { %7202 = vmatpush3.msra.mxu0 %v247_v0  ;;  %7223 = vmatprep.mubr.msk.f32.mxu1 %vm7825_vm1, %v9363_v12  ;;  %v6946_v14 = vld [vmem:[%s9359_s2] ss:$0 sm:$0xff]  ;;  %s7827_s7 = smov 64   ;;  %s7828_s8 = smov 88   ;;  %vm1909_vm4 = vcmask 195584   ;;  %vm1912_vm5 = vcmask 326656  }
  0x18   : > { %7203 = vmatprep.subr.mxu0 %v246_v1  ;;  %s9458_s9 = smov (!%p231_p10, %s6944_s9), 15  ;;  %v385_v39 = vld [vmem:[%s9360_s3] sm:$0xff]  ;;  %s7832_s12 = smov 56   ;;  %vm1914_vm6 = vcmask 392192   ;;  %vm1916_vm7 = vcmask 457728   ;;  %vm6519_vm8 = vcmask 523264  }
  0x19   : > { %7204 = vmatpush3.msra.mxu0 %v246_v1  ;;  %s6945_s14 = sshll.u32 %s9458_s9, 3  ;;  %s7829_s9 = smov 120  }
  0x1a   : > { %7205 = vmatprep.subr.mxu0 %v245_v2  ;;  %s234_s17 = scalar_lea.vmem %s9357_s0, %s6945_s14  ;;  %s7833_s13 = smov 80  }
  0x1b   : > { %7206 = vmatpush3.msra.mxu0 %v245_v2  ;;  %v236_v4 = vld [vmem:[%s234_s17] sm:$0xff]  ;;  %v237_v5 = vld [vmem:[%s234_s17 + $0x8] sm:$0xff]  ;;  %v238_v6 = vld [vmem:[%s234_s17 + $0x10] sm:$0xff]  ;;  %s7834_s14 = smov 112   ;;  %s7836_s23 = smov 72  }
  0x1c   : > { %7207 = vmatprep.subr.mxu0 %v244_v3  ;;  %7209 = vmatprep.mubr.msk.f32.mxu0 %vm255_vm0, %v236_v4  ;;  %v239_v7 = vld [vmem:[%s234_s17 + $0x18] sm:$0xff]  ;;  %v240_v8 = vld [vmem:[%s234_s17 + $0x20] sm:$0xff]  ;;  %v241_v9 = vld [vmem:[%s234_s17 + $0x28] sm:$0xff]  ;;  %s7837_s25 = smov 104   ;;  %s7840_s10 = smov 16  }
  0x1d   : > { %7208 = vmatpush3.msra.mxu0 %v244_v3  ;;  %v242_v10 = vld [vmem:[%s234_s17 + $0x30] sm:$0xff]  ;;  %v243_v11 = vld [vmem:[%s234_s17 + $0x38] sm:$0xff]  ;;  %s7835_s17 = smov 48   ;;  %s7841_s11 = smov 24  }
  0x1e   : > { %7210 = vmatmul.mubr.msk.f32.vlgmr.msra.gmra.mxu0 %vm255_vm0, %v237_v5  ;;  %7246 = vmatprep.subr.mxu0 %v9363_v12  ;;  %s7843_s6 = smov [#allocation4]  }
  0x1f   : > { %7212 = vmatprep.mubr.msk.f32.mxu0 %vm255_vm0, %v238_v6 }
  0x22   : > { %7213 = vmatmul.mubr.msk.f32.gmra.mxu0 %vm255_vm0, %v239_v7 }
  0x23   : > { %7215 = vmatprep.mubr.msk.f32.mxu0 %vm255_vm0, %v240_v8 }
  0x26   : > { %7216 = vmatmul.mubr.msk.f32.gmra.mxu0 %vm255_vm0, %v241_v9 }
  0x27   : > { %7218 = vmatprep.mubr.msk.f32.mxu0 %vm255_vm0, %v242_v10 }
  0x2a   : > { %7219 = vmatmul.mubr.msk.f32.gmra.mxu0 %vm255_vm0, %v243_v11 }
  0x2b   : > { %7248 = vmatprep.mubr.msk.f32.mxu0 %vm7825_vm1, %v9363_v12 }
  0xde   : > { %v7211_v13 = vpop.f32.mrf.mxu0 }
  0xdf   : > { %v7960_v19 = vadd.f32 %v7211_v13, %v6946_v14 }
  0xe0   : > { %v346_v15 = vpop.f32.mrf.mxu0 }
  0xe1   : > { %v7956_v16 = vadd.f32 %v6946_v14, %v346_v15 }
  0xe2   : > { %v7214_v17 = vpop.f32.mrf.mxu0 }
  0xe3   : > { %390 = vrot.lane.b32.xlu0 %v7956_v16, %s7826_s26  ;;  %v7968_v23 = vadd.f32 %v7214_v17, %v6946_v14 }
  0xe4   : > { %v356_v18 = vpop.f32.mrf.mxu0 }
  0xe5   : > { %v7962_v20 = vadd.f32 %v6946_v14, %v356_v18 }
  0xe6   : > { %v7217_v21 = vpop.f32.mrf.mxu0 }
  0xe7   : > { %545 = vrot.lane.b32.xlu1 %v7962_v20, %s7826_s26  ;;  %468 = vrot.lane.b32.xlu0 %v7960_v19, %s7826_s26  ;;  %v7974_v26 = vadd.f32 %v7217_v21, %v6946_v14 }
  0xe8   : > { %v366_v22 = vpop.f32.mrf.mxu0 }
  0xe9   : > { %v7970_v24 = vadd.f32 %v6946_v14, %v366_v22 }
  0xea   : > { %v7220_v25 = vpop.f32.mrf.mxu0 }
  0xeb   : > { %622 = vrot.lane.b32.xlu1 %v7968_v23, %s7826_s26  ;;  %699 = vrot.lane.b32.xlu0 %v7970_v24, %s7826_s26  ;;  %v7982_v29 = vadd.f32 %v7220_v25, %v6946_v14 }
  0xec   : > { %v376_v27 = vpop.f32.mrf.mxu0 }
  0xed   : > { %v7978_v28 = vadd.f32 %v6946_v14, %v376_v27 }
  0xef   : > { %776 = vrot.lane.b32.xlu1 %v7974_v26, %s7826_s26  ;;  %853 = vrot.lane.b32.xlu0 %v7978_v28, %s7826_s26 }
  0xf3   : > { %930 = vrot.lane.b32.xlu1 %v7982_v29, %s7826_s26 }
 0x155   : > { %v391_v30 = vpop.permute.xlu0 %390 }
 0x156   : > { %7222 = vmatpush3.xpose.msk.msra.mxu1 %vm392_vm2, %v391_v30 }
 0x157   : > { %7226 = vmatprep.subr.mxu1 %v9363_v12 }
 0x159   : > { %v546_v31 = vpop.permute.xlu1 %545  ;;  %7224 = vmatmul.mubr.msk.f32.vlgmr.msra.gmra.mxu1 %vm392_vm2, %v7956_v16  ;;  %v469_v32 = vpop.permute.xlu0 %468 }
 0x15a   : > { %7227 = vmatpush3.xpose.msk.msra.mxu1 %vm392_vm2, %v469_v32  ;;  %7228 = vmatprep.mubr.msk.f32.mxu1 %vm7825_vm1, %v9363_v12 }
 0x15b   : > { %7231 = vmatprep.subr.mxu1 %v9363_v12 }
 0x15d   : > { %v623_v33 = vpop.permute.xlu1 %622  ;;  %7229 = vmatmul.mubr.msk.f32.vlgmr.msra.gmra.mxu1 %vm392_vm2, %v7960_v19  ;;  %v700_v35 = vpop.permute.xlu0 %699 }
 0x15e   : > { %7232 = vmatpush3.xpose.msk.msra.mxu1 %vm392_vm2, %v546_v31  ;;  %7233 = vmatprep.mubr.msk.f32.mxu1 %vm7825_vm1, %v9363_v12 }
 0x15f   : > { %7236 = vmatprep.subr.mxu1 %v9363_v12 }
 0x161   : > { %v777_v34 = vpop.permute.xlu1 %776  ;;  %7234 = vmatmul.mubr.msk.f32.vlgmr.msra.gmra.mxu1 %vm392_vm2, %v7962_v20  ;;  %v854_v37 = vpop.permute.xlu0 %853 }
 0x162   : > { %7237 = vmatpush3.xpose.msk.msra.mxu1 %vm392_vm2, %v623_v33  ;;  %7247 = vmatpush3.xpose.msk.msra.mxu0 %vm392_vm2, %v777_v34 }
 0x163   : > { %7238 = vmatprep.mubr.msk.f32.mxu1 %vm7825_vm1, %v9363_v12  ;;  %7256 = vmatprep.subr.mxu0 %v9363_v12 }
 0x164   : > { %7241 = vmatprep.subr.mxu1 %v9363_v12 }
 0x165   : > { %7249 = vmatmul.mubr.msk.f32.vlgmr.msra.gmra.mxu0 %vm392_vm2, %v7974_v26  ;;  %v931_v36 = vpop.permute.xlu1 %930  ;;  %7239 = vmatmul.mubr.msk.f32.vlgmr.msra.gmra.mxu1 %vm392_vm2, %v7968_v23 }
 0x166   : > { %7242 = vmatpush3.xpose.msk.msra.mxu1 %vm392_vm2, %v700_v35  ;;  %7257 = vmatpush3.xpose.msk.msra.mxu0 %vm392_vm2, %v931_v36 }
 0x167   : > { %7243 = vmatprep.mubr.msk.f32.mxu1 %vm7825_vm1, %v9363_v12  ;;  %7258 = vmatprep.mubr.msk.f32.mxu0 %vm7825_vm1, %v9363_v12 }
 0x168   : > { %7251 = vmatprep.subr.mxu1 %v9363_v12  ;;  %7266 = vmatprep.subr.mxu0 %v9363_v12 }
 0x169   : > { %7244 = vmatmul.mubr.msk.f32.vlgmr.msra.gmra.mxu1 %vm392_vm2, %v7970_v24  ;;  %7259 = vmatmul.mubr.msk.f32.vlgmr.msra.gmra.mxu0 %vm392_vm2, %v7982_v29 }
 0x16a   : > { %7252 = vmatpush3.xpose.msk.msra.mxu1 %vm392_vm2, %v854_v37  ;;  %7253 = vmatprep.mubr.msk.f32.mxu1 %vm7825_vm1, %v9363_v12 }
 0x16b   : > { %7261 = vmatprep.subr.mxu1 %v9363_v12  ;;  %7268 = vmatprep.mubr.msk.f32.mxu0 %vm7825_vm1, %v9363_v12 }
 0x16d   : > { %7254 = vmatmul.mubr.msk.f32.vlgmr.msra.gmra.mxu1 %vm392_vm2, %v7978_v28 }
 0x16e   : > { %7263 = vmatprep.mubr.msk.f32.mxu1 %vm7825_vm1, %v9363_v12 }
 0x219   : > { %v463_v38 = vpop.f32.mrf.mxu1 }
 0x21a   : > { %v1006_v40 = vmul.f32 0.35355338, %v463_v38 }
 0x21b   : > { %v7225_v41 = vpop.f32.mrf.mxu1 }
 0x21c   : > { %v1014_v42 = vadd.f32 %v1006_v40, %v385_v39 }
 0x21d   : > { %v540_v43 = vpop.f32.mrf.mxu1 }
 0x21e   : > { %v1007_v44 = vmul.f32 0.35355338, %v540_v43  ;;  %v1022_v45 = vsel %vm392_vm2, %v1014_v42, -inf }
 0x21f   : > { %1023 = vmax.xlane.f32.xlu0 %v1022_v45  ;;  %v7230_v46 = vpop.f32.mrf.mxu1 }
 0x220   : > { %v1015_v47 = vadd.f32 %v1007_v44, %v385_v39 }
 0x221   : > { %v617_v48 = vpop.f32.mrf.mxu1 }
 0x222   : > { %v1008_v49 = vmul.f32 0.35355338, %v617_v48  ;;  %v1025_v50 = vsel %vm392_vm2, %v1015_v47, -inf }
 0x223   : > { %1026 = vmax.xlane.f32.xlu1 %v1025_v50  ;;  %v7235_v51 = vpop.f32.mrf.mxu1 }
 0x224   : > { %v1016_v52 = vadd.f32 %v1008_v49, %v385_v39 }
 0x225   : > { %v694_v53 = vpop.f32.mrf.mxu1  ;;  %v848_v54 = vpop.f32.mrf.mxu0 }
 0x226   : > { %v1009_v55 = vmul.f32 0.35355338, %v694_v53  ;;  %v1011_v56 = vmul.f32 0.35355338, %v848_v54  ;;  %v1028_v57 = vsel %vm392_vm2, %v1016_v52, -inf }
 0x227   : > { %v7250_v58 = vpop.f32.mrf.mxu0  ;;  %1029 = vmax.xlane.f32.xlu0 %v1028_v57  ;;  %v7240_v59 = vpop.f32.mrf.mxu1 }
 0x228   : > { %v1017_v60 = vadd.f32 %v1009_v55, %v385_v39  ;;  %v1019_v1 = vadd.f32 %v1011_v56, %v385_v39 }
 0x229   : > { %v771_v61 = vpop.f32.mrf.mxu1  ;;  %v1002_v62 = vpop.f32.mrf.mxu0 }
 0x22a   : > { %v1013_v63 = vmul.f32 0.35355338, %v1002_v62  ;;  %v1031_v0 = vsel %vm392_vm2, %v1017_v60, -inf  ;;  %v1037_v5 = vsel %vm392_vm2, %v1019_v1, -inf  ;;  %v1010_v9 = vmul.f32 0.35355338, %v771_v61 }
 0x22b   : > { %v7260_v2 = vpop.f32.mrf.mxu0  ;;  %1032 = vmax.xlane.f32.xlu0 %v1031_v0  ;;  %v7245_v3 = vpop.f32.mrf.mxu1 }
 0x22c   : > { %v1021_v6 = vadd.f32 %v1013_v63, %v385_v39  ;;  %v8059_v11 = vadd.f32 %v1010_v9, %v385_v39 }
 0x22d   : > { %v925_v4 = vpop.f32.mrf.mxu1 }
 0x22e   : > { %v1043_v8 = vsel %vm392_vm2, %v1021_v6, -inf  ;;  %v1012_v10 = vmul.f32 0.35355338, %v925_v4  ;;  %v1034_v13 = vsel %vm392_vm2, %v8059_v11, -inf }
 0x22f   : > { %1038 = vmax.xlane.f32.xlu0 %v1037_v5  ;;  %v7255_v7 = vpop.f32.mrf.mxu1 }
 0x230   : > { %v8063_v14 = vadd.f32 %v1012_v10, %v385_v39 }
 0x232   : > { %v1040_v15 = vsel %vm392_vm2, %v8063_v14, -inf }
 0x233   : > { %1044 = vmax.xlane.f32.xlu0 %v1043_v8 }
 0x234   : > { %1134 = vrot.lane.b32.xlu1 %v7956_v16, %s7827_s7 }
 0x238   : > { %1286 = vrot.lane.b32.xlu1 %v7962_v20, %s7827_s7 }
 0x23c   : > { %1362 = vrot.lane.b32.xlu1 %v7968_v23, %s7827_s7 }
 0x240   : > { %1514 = vrot.lane.b32.xlu1 %v7974_v26, %s7827_s7 }
 0x249   : > { %1210 = vrot.lane.b32.xlu0 %v7960_v19, %s7827_s7 }
 0x24d   : > { %1438 = vrot.lane.b32.xlu0 %v7970_v24, %s7827_s7 }
 0x251   : > { %1590 = vrot.lane.b32.xlu0 %v7978_v28, %s7827_s7 }
 0x264   : > { %1035 = vmax.xlane.f32.xlu1 %v1034_v13 }
 0x268   : > { %1041 = vmax.xlane.f32.xlu1 %v1040_v15 }
 0x279   : > { %1666 = vrot.lane.b32.xlu1 %v7982_v29, %s7827_s7 }
 0x2a8   : > { %v1024_v17 = vpop.xlane.xlu0 %1023 }
 0x2a9   : > { %v1046_v18 = vsub.f32 %v1014_v42, %v1024_v17 }
 0x2ab   : > { %v1054_v21 = vmul.f32 1.442695, %v1046_v18 }
 0x2ac   : > { %v1027_v22 = vpop.xlane.xlu1 %1026 }
 0x2ad   : > { %7604 = vpow2.f32 %v1054_v21  ;;  %v1047_v25 = vsub.f32 %v1015_v47, %v1027_v22 }
 0x2af   : > { %v1056_v27 = vmul.f32 1.442695, %v1047_v25 }
 0x2b0   : > { %v1135_v30 = vpop.permute.xlu1 %1134  ;;  %v1030_v31 = vpop.xlane.xlu0 %1029 }
 0x2b1   : > { %7606 = vpow2.f32 %v1056_v27  ;;  %v1048_v32 = vsub.f32 %v1016_v52, %v1030_v31  ;;  %7262 = vmatpush3.msra.mxu1 %v1135_v30 }
 0x2b2   : > { %7271 = vmatprep.subr.mxu1 %v9363_v12 }
 0x2b3   : > { %v1058_v33 = vmul.f32 1.442695, %v1048_v32 }
 0x2b4   : > { %v1033_v34 = vpop.xlane.xlu0 %1032  ;;  %v1287_v56 = vpop.permute.xlu1 %1286 }
 0x2b5   : > { %7608 = vpow2.f32 %v1058_v33  ;;  %v1049_v38 = vsub.f32 %v1017_v60, %v1033_v34 }
 0x2b7   : > { %v1060_v44 = vmul.f32 1.442695, %v1049_v38 }
 0x2b8   : > { %v1039_v35 = vpop.xlane.xlu0 %1038  ;;  %v8101_v57 = vpop.permute.xlu1 %1362 }
 0x2b9   : > { %v1051_v36 = vsub.f32 %v1019_v1, %v1039_v35 }
 0x2ba   : > { %v8070_v37 = vpop.eup %7604 }
 0x2bb   : > { %v1064_v39 = vmul.f32 1.442695, %v1051_v36  ;;  %v1070_v40 = vsel %vm392_vm2, %v8070_v37, 0.0 }
 0x2bc   : > { %1071 = vadd.xlane.f32.xlu1 %v1070_v40  ;;  %v1045_v41 = vpop.xlane.xlu0 %1044  ;;  %v8103_v58 = vpop.permute.xlu1 %1514 }
 0x2bd   : > { %7610 = vpow2.f32 %v1064_v39  ;;  %v1053_v42 = vsub.f32 %v1021_v6, %v1045_v41 }
 0x2be   : > { %v8074_v43 = vpop.eup %7606 }
 0x2bf   : > { %v1068_v45 = vmul.f32 1.442695, %v1053_v42  ;;  %v1073_v46 = vsel %vm392_vm2, %v8074_v43, 0.0 }
 0x2c0   : > { %1074 = vadd.xlane.f32.xlu0 %v1073_v46  ;;  %v1211_v47 = vpop.permute.xlu0 %1210 }
 0x2c1   : > { %7612 = vpow2.f32 %v1068_v45  ;;  %7267 = vmatpush3.msra.mxu0 %v1211_v47  ;;  %v7830_v45 = vmov 1983009808  }
 0x2c2   : > { %v8078_v48 = vpop.eup %7608  ;;  %7276 = vmatprep.subr.mxu0 %v9363_v12  ;;  %7614 = vpow2.f32 %v1060_v44  ;;  %v1745_v46 = vunpack.c.l.s4 %v7830_v45 }
 0x2c3   : > { %v1076_v49 = vsel %vm392_vm2, %v8078_v48, 0.0 }
 0x2c4   : > { %1077 = vadd.xlane.f32.xlu1 %v1076_v49  ;;  %v1439_v5 = vpop.permute.xlu0 %1438  ;;  %v1747_v49 = vlaneseq }
 0x2c8   : > { %v8143_v7 = vpop.permute.xlu0 %1590 }
 0x2ca   : > { %v8083_v50 = vpop.eup %7610 }
 0x2cb   : > { %v1085_v51 = vsel %vm392_vm2, %v8083_v50, 0.0 }
 0x2cc   : > { %1086 = vadd.xlane.f32.xlu0 %v1085_v51 }
 0x2ce   : > { %v8087_v52 = vpop.eup %7612 }
 0x2cf   : > { %v1091_v53 = vsel %vm392_vm2, %v8087_v52, 0.0  ;;  %v8091_v54 = vpop.eup %7614 }
 0x2d0   : > { %1092 = vadd.xlane.f32.xlu0 %v1091_v53  ;;  %v1079_v55 = vsel %vm392_vm2, %v8091_v54, 0.0 }
 0x2d4   : > { %1080 = vadd.xlane.f32.xlu0 %v1079_v55 }
 0x2d5   : > { %1998 = vrot.lane.b32.xlu1 %v7960_v19, %s7828_s8 }
 0x2d9   : > { %1996 = vrot.lane.b32.xlu1 %v7960_v19, %s7829_s9 }
 0x2dd   : > { %2154 = vrot.lane.b32.xlu1 %v7968_v23, %s7828_s8 }
 0x2ea   : > { %1920 = vrot.lane.b32.xlu0 %v7956_v16, %s7828_s8 }
 0x2ed   : > { %v1036_v59 = vpop.xlane.xlu1 %1035 }
 0x2ee   : > { %v1050_v60 = vsub.f32 %v8059_v11, %v1036_v59  ;;  %1918 = vrot.lane.b32.xlu0 %v7956_v16, %s7829_s9 }
 0x2f0   : > { %v1062_v61 = vmul.f32 1.442695, %v1050_v60 }
 0x2f1   : > { %v1042_v62 = vpop.xlane.xlu1 %1041 }
 0x2f2   : > { %7616 = vpow2.f32 %v1062_v61  ;;  %v1052_v63 = vsub.f32 %v8063_v14, %v1042_v62  ;;  %2076 = vrot.lane.b32.xlu0 %v7962_v20, %s7828_s8  ;;  %v8167_v61 = vshrl.u32 %v1747_v49, 7 }
 0x2f4   : > { %v1066_v0 = vmul.f32 1.442695, %v1052_v63 }
 0x2f5   : > { %v8141_v6 = vpop.permute.xlu1 %1666 }
 0x2f6   : > { %7618 = vpow2.f32 %v1066_v0  ;;  %2074 = vrot.lane.b32.xlu0 %v7962_v20, %s7829_s9 }
 0x2fa   : > { %2232 = vrot.lane.b32.xlu0 %v7970_v24, %s7828_s8 }
 0x2fe   : > { %2230 = vrot.lane.b32.xlu0 %v7970_v24, %s7829_s9 }
 0x2ff   : > { %v8119_v1 = vpop.eup %7616 }
 0x300   : > { %v1082_v2 = vsel %vm392_vm2, %v8119_v1, 0.0 }
 0x301   : > { %1083 = vadd.xlane.f32.xlu1 %v1082_v2 }
 0x302   : > { %2388 = vrot.lane.b32.xlu0 %v7978_v28, %s7828_s8 }
 0x303   : > { %v8125_v3 = vpop.eup %7618 }
 0x304   : > { %v1088_v4 = vsel %vm392_vm2, %v8125_v3, 0.0 }
 0x305   : > { %1089 = vadd.xlane.f32.xlu1 %v1088_v4 }
 0x306   : > { %2386 = vrot.lane.b32.xlu0 %v7978_v28, %s7829_s9 }
 0x316   : > { %2152 = vrot.lane.b32.xlu1 %v7968_v23, %s7829_s9 }
 0x31a   : > { %2310 = vrot.lane.b32.xlu1 %v7974_v26, %s7828_s8 }
 0x31e   : > { %2308 = vrot.lane.b32.xlu1 %v7974_v26, %s7829_s9 }
 0x322   : > { %2466 = vrot.lane.b32.xlu1 %v7982_v29, %s7828_s8  ;;  %s7838_s8 = smov 40  }
 0x326   : > { %2464 = vrot.lane.b32.xlu1 %v7982_v29, %s7829_s9  ;;  %s7839_s9 = smov 8  }
 0x345   : > { %v1072_v8 = vpop.xlane.xlu1 %1071 }
 0x346   : > { %7620 = vrcp.f32 %v1072_v8 }
 0x349   : > { %v1075_v9 = vpop.xlane.xlu0 %1074 }
 0x34a   : > { %7622 = vrcp.f32 %v1075_v9 }
 0x34d   : > { %v1078_v10 = vpop.xlane.xlu1 %1077 }
 0x34e   : > { %7624 = vrcp.f32 %v1078_v10 }
 0x353   : > { %v7621_v11 = vpop.eup %7620 }
 0x354   : > { %v1102_v13 = vmul.f32 %v7621_v11, %v1072_v8 }
 0x355   : > { %v1087_v14 = vpop.xlane.xlu0 %1086 }
 0x356   : > { %v1110_v15 = vsub.f32 2.0, %v1102_v13  ;;  %7626 = vrcp.f32 %v1087_v14 }
 0x357   : > { %v7623_v17 = vpop.eup %7622 }
 0x358   : > { %v1118_v18 = vmul.f32 %v7621_v11, %v1110_v15  ;;  %v1103_v21 = vmul.f32 %v7623_v17, %v1075_v9 }
 0x359   : > { %v1093_v22 = vpop.xlane.xlu0 %1092 }
 0x35a   : > { %v1126_v25 = vmul.f32 %v8070_v37, %v1118_v18  ;;  %v1111_v27 = vsub.f32 2.0, %v1103_v21  ;;  %7628 = vrcp.f32 %v1093_v22 }
 0x35b   : > { %v7625_v30 = vpop.eup %7624 }
 0x35c   : > { %v1119_v31 = vmul.f32 %v7623_v17, %v1111_v27  ;;  %v1104_v32 = vmul.f32 %v7625_v30, %v1078_v10  ;;  %7264 = vmatmul.mubr.msk.f32.vlgmr.msra.gmra.mxu1 %vm392_vm2, %v1126_v25 }
 0x35d   : > { %7272 = vmatpush3.msra.mxu1 %v1287_v56  ;;  %v1081_v33 = vpop.xlane.xlu0 %1080  ;;  %7273 = vmatprep.mubr.msk.f32.mxu1 %vm7825_vm1, %v9363_v12  ;;  %v1746_v56 = vunpack.c.0.s8 %v1745_v46 }
 0x35e   : > { %v1127_v34 = vmul.f32 %v8074_v43, %v1119_v31  ;;  %v1112_v35 = vsub.f32 2.0, %v1104_v32  ;;  %7630 = vrcp.f32 %v1081_v33  ;;  %7281 = vmatprep.subr.mxu1 %v9363_v12 }
 0x35f   : > { %v8175_v4 = vsub.s32 %v1746_v56, %v8167_v61 }
 0x360   : > { %v1120_v36 = vmul.f32 %v7625_v30, %v1112_v35  ;;  %7269 = vmatmul.mubr.msk.f32.vlgmr.msra.gmra.mxu0 %vm392_vm2, %v1127_v34 }
 0x361   : > { %7277 = vmatpush3.msra.mxu0 %v8101_v57  ;;  %7278 = vmatprep.mubr.msk.f32.mxu0 %vm7825_vm1, %v9363_v12 }
 0x362   : > { %v1128_v37 = vmul.f32 %v8078_v48, %v1120_v36  ;;  %7286 = vmatprep.subr.mxu0 %v9363_v12 }
 0x363   : > { %v7627_v38 = vpop.eup %7626 }
 0x364   : > { %v1742_v39 = vcombine.low %v1126_v25, %v1128_v37  ;;  %v1743_v40 = vcombine.high %v1126_v25, %v1128_v37  ;;  %v1107_v41 = vmul.f32 %v7627_v38, %v1087_v14  ;;  %7274 = vmatmul.mubr.msk.f32.vlgmr.msra.gmra.mxu1 %vm392_vm2, %v1128_v37 }
 0x365   : > { %7282 = vmatpush3.msra.mxu1 %v1439_v5  ;;  %7283 = vmatprep.mubr.msk.f32.mxu1 %vm7825_vm1, %v9363_v12 }
 0x366   : > { %v1115_v42 = vsub.f32 2.0, %v1107_v41  ;;  %7291 = vmatprep.subr.mxu1 %v9363_v12  ;;  %v8189_v9 = vrot.slane %v1743_v40, %v8175_v4  ;;  %v7831_v40 = vmov 1934713408  }
 0x367   : > { %v7629_v43 = vpop.eup %7628  ;;  %v1809_v41 = vunpack.c.l.s4 %v7831_v40 }
 0x368   : > { %v1109_v44 = vmul.f32 %v7629_v43, %v1093_v22  ;;  %v1123_v47 = vmul.f32 %v7627_v38, %v1115_v42 }
 0x36a   : > { %v1117_v48 = vsub.f32 2.0, %v1109_v44  ;;  %v8162_v57 = vmul.f32 %v8083_v50, %v1123_v47  ;;  %v1999_v50 = vpop.permute.xlu1 %1998  ;;  %v1810_v47 = vunpack.c.0.s8 %v1809_v41 }
 0x36b   : > { %v7631_v51 = vpop.eup %7630 }
 0x36c   : > { %v1125_v53 = vmul.f32 %v7629_v43, %v1117_v48  ;;  %v1105_v55 = vmul.f32 %v7631_v51, %v1081_v33 }
 0x36e   : > { %v8165_v59 = vmul.f32 %v8087_v52, %v1125_v53  ;;  %v1113_v60 = vsub.f32 2.0, %v1105_v55  ;;  %v8183_v52 = vrot.slane %v1742_v39, %v8175_v4  ;;  %v1997_v15 = vpop.permute.xlu1 %1996 }
 0x370   : > { %v1790_v62 = vcombine.low %v8162_v57, %v8165_v59  ;;  %v1791_v63 = vcombine.high %v8162_v57, %v8165_v59  ;;  %v1121_v0 = vmul.f32 %v7631_v51, %v1113_v60 }
 0x372   : > { %v1129_v2 = vmul.f32 %v8091_v54, %v1121_v0  ;;  %v2155_v17 = vpop.permute.xlu1 %2154  ;;  %v1798_v51 = vrot.slane %v1790_v62, %v8175_v4  ;;  %v1805_v55 = vrot.slane %v1791_v63, %v8175_v4 }
 0x374   : > { %v1758_v5 = vcombine.low %v1127_v34, %v1129_v2  ;;  %v1759_v8 = vcombine.high %v1127_v34, %v1129_v2  ;;  %7279 = vmatmul.mubr.msk.f32.vlgmr.msra.gmra.mxu0 %vm392_vm2, %v1129_v2 }
 0x375   : > { %7287 = vmatpush3.msra.mxu0 %v8103_v58  ;;  %7288 = vmatprep.mubr.msk.f32.mxu0 %vm7825_vm1, %v9363_v12 }
 0x376   : > { %7296 = vmatprep.subr.mxu0 %v9363_v12  ;;  %v8186_v54 = vrot.slane %v1758_v5, %v8175_v4  ;;  %v8192_v10 = vrot.slane %v1759_v8, %v8175_v4 }
 0x378   : > { %7289 = vmatmul.mubr.msk.f32.vlgmr.msra.gmra.mxu0 %vm392_vm2, %v8162_v57  ;;  %v1806_v58 = vcombine.low %v8183_v52, %v8186_v54  ;;  %v1807_v11 = vcombine.high %v8183_v52, %v8186_v54  ;;  %v1822_v13 = vcombine.low %v8189_v9, %v8192_v10  ;;  %v1823_v14 = vcombine.high %v8189_v9, %v8192_v10 }
 0x379   : > { %7297 = vmatpush3.msra.mxu0 %v8141_v6  ;;  %7298 = vmatprep.mubr.msk.f32.mxu0 %vm7825_vm1, %v9363_v12  ;;  %v1921_v6 = vpop.permute.xlu0 %1920 }
 0x37a   : > { %7306 = vmatprep.subr.mxu0 %v9363_v12 }
 0x37c   : > { %7299 = vmatmul.mubr.msk.f32.vlgmr.msra.gmra.mxu0 %vm392_vm2, %v8165_v59 }
 0x37d   : > { %7307 = vmatpush3.xpose.msk.msra.mxu0 %vm392_vm2, %v1999_v50  ;;  %7308 = vmatprep.mubr.msk.f32.mxu0 %vm7825_vm1, %v9363_v12  ;;  %v1919_v22 = vpop.permute.xlu0 %1918 }
 0x37e   : > { %7316 = vmatprep.subr.mxu0 %v9363_v12 }
 0x380   : > { %7309 = vmatmul.mubr.msk.f32.vlgmr.msra.gmra.mxu0 %vm392_vm2, %v1997_v15 }
 0x381   : > { %7317 = vmatpush3.xpose.msk.msra.mxu0 %vm392_vm2, %v2155_v17  ;;  %7318 = vmatprep.mubr.msk.f32.mxu0 %vm7825_vm1, %v9363_v12  ;;  %v2077_v27 = vpop.permute.xlu0 %2076 }
 0x382   : > { %7326 = vmatprep.subr.mxu0 %v9363_v12 }
 0x385   : > { %v2075_v36 = vpop.permute.xlu0 %2074 }
 0x389   : > { %v2233_v45 = vpop.permute.xlu0 %2232 }
 0x38a   : > { %v1084_v18 = vpop.xlane.xlu1 %1083 }
 0x38b   : > { %7632 = vrcp.f32 %v1084_v18 }
 0x38d   : > { %v2231_v56 = vpop.permute.xlu0 %2230 }
 0x38e   : > { %v1090_v21 = vpop.xlane.xlu1 %1089 }
 0x38f   : > { %7634 = vrcp.f32 %v1090_v21 }
 0x391   : > { %v2389_v15 = vpop.permute.xlu0 %2388 }
 0x392   : > { %v2153_v25 = vpop.permute.xlu1 %2152 }
 0x393   : > { %7319 = vmatmul.mubr.msk.f32.vlgmr.msra.gmra.mxu0 %vm392_vm2, %v2153_v25 }
 0x394   : > { %7328 = vmatprep.mubr.msk.f32.mxu0 %vm7825_vm1, %v9363_v12 }
 0x396   : > { %v2311_v30 = vpop.permute.xlu1 %2310 }
 0x397   : > { %7327 = vmatpush3.xpose.msk.msra.mxu0 %vm392_vm2, %v2311_v30 }
 0x398   : > { %v7633_v31 = vpop.eup %7632  ;;  %7336 = vmatprep.subr.mxu0 %v9363_v12 }
 0x399   : > { %v1106_v32 = vmul.f32 %v7633_v31, %v1084_v18 }
 0x39a   : > { %v2309_v33 = vpop.permute.xlu1 %2308 }
 0x39b   : > { %v1114_v34 = vsub.f32 2.0, %v1106_v32  ;;  %7329 = vmatmul.mubr.msk.f32.vlgmr.msra.gmra.mxu0 %vm392_vm2, %v2309_v33 }
 0x39c   : > { %v7635_v35 = vpop.eup %7634  ;;  %7338 = vmatprep.mubr.msk.f32.mxu0 %vm7825_vm1, %v9363_v12 }
 0x39d   : > { %v1122_v37 = vmul.f32 %v7633_v31, %v1114_v34  ;;  %v1108_v38 = vmul.f32 %v7635_v35, %v1090_v21 }
 0x39e   : > { %v2467_v39 = vpop.permute.xlu1 %2466 }
 0x39f   : > { %v1130_v42 = vmul.f32 %v8119_v1, %v1122_v37  ;;  %v1116_v43 = vsub.f32 2.0, %v1108_v38  ;;  %7337 = vmatpush3.xpose.msk.msra.mxu0 %vm392_vm2, %v2467_v39  ;;  %v386_v38 = vld [vmem:[%s9360_s3 + $0x8] sm:$0xff] }
 0x3a0   : > { %7346 = vmatprep.subr.mxu0 %v9363_v12 }
 0x3a1   : > { %v1124_v44 = vmul.f32 %v7635_v35, %v1116_v43  ;;  %7284 = vmatmul.mubr.msk.f32.vlgmr.msra.gmra.mxu1 %vm392_vm2, %v1130_v42 }
 0x3a2   : > { %7292 = vmatpush3.msra.mxu1 %v8143_v7  ;;  %v2465_v46 = vpop.permute.xlu1 %2464  ;;  %7293 = vmatprep.mubr.msk.f32.mxu1 %vm7825_vm1, %v9363_v12  ;;  %v8244_v7 = vsub.s32 %v1810_v47, %v8167_v61 }
 0x3a3   : > { %v1132_v48 = vmul.f32 %v8125_v3, %v1124_v44  ;;  %7339 = vmatmul.mubr.msk.f32.vlgmr.msra.gmra.mxu0 %vm392_vm2, %v2465_v46  ;;  %7301 = vmatprep.subr.mxu1 %v9363_v12 }
 0x3a4   : > { %7348 = vmatprep.mubr.msk.f32.mxu0 %vm7825_vm1, %v9363_v12  ;;  %v8265_v62 = vrot.slane %v1806_v58, %v8244_v7  ;;  %v8271_v57 = vrot.slane %v1807_v11, %v8244_v7  ;;  %v8277_v59 = vrot.slane %v1822_v13, %v8244_v7  ;;  %v8296_v52 = vrot.slane %v1823_v14, %v8244_v7 }
 0x3a5   : > { %v1774_v1 = vcombine.low %v1130_v42, %v1132_v48  ;;  %v1775_v49 = vcombine.high %v1130_v42, %v1132_v48  ;;  %7294 = vmatmul.mubr.msk.f32.vlgmr.msra.gmra.mxu1 %vm392_vm2, %v1132_v48 }
 0x3a6   : > { %7302 = vmatpush3.xpose.msk.msra.mxu1 %vm392_vm2, %v1921_v6  ;;  %7303 = vmatprep.mubr.msk.f32.mxu1 %vm7825_vm1, %v9363_v12  ;;  %9391 = vst [vmem:[#allocation8_spill] sm:$0xff] %v8265_v62  ;;  %9392 = vst [vmem:[#allocation9_spill] sm:$0xff] %v8271_v57  ;;  %v2387_v6 = vpop.permute.xlu0 %2386 }
 0x3a7   : > { %7311 = vmatprep.subr.mxu1 %v9363_v12  ;;  %v1782_v3 = vrot.slane %v1774_v1, %v8175_v4  ;;  %v1789_v53 = vrot.slane %v1775_v49, %v8175_v4  ;;  %9393 = vst [vmem:[#allocation10_spill] sm:$0xff] %v8277_v59  ;;  %9398 = vst [vmem:[#allocation15_spill] sm:$0xff] %v8296_v52 }
 0x3a9   : > { %7304 = vmatmul.mubr.msk.f32.vlgmr.msra.gmra.mxu1 %vm392_vm2, %v1919_v22  ;;  %v1838_v60 = vcombine.low %v1782_v3, %v1798_v51  ;;  %v1839_v61 = vcombine.high %v1782_v3, %v1798_v51  ;;  %v1854_v0 = vcombine.low %v1789_v53, %v1805_v55  ;;  %v1855_v2 = vcombine.high %v1789_v53, %v1805_v55 }
 0x3aa   : > { %7312 = vmatpush3.xpose.msk.msra.mxu1 %vm392_vm2, %v2077_v27  ;;  %7313 = vmatprep.mubr.msk.f32.mxu1 %vm7825_vm1, %v9363_v12 }
 0x3ab   : > { %7321 = vmatprep.subr.mxu1 %v9363_v12  ;;  %v8281_v63 = vrot.slane %v1838_v60, %v8244_v7  ;;  %v8284_v50 = vrot.slane %v1839_v61, %v8244_v7  ;;  %v8287_v5 = vrot.slane %v1854_v0, %v8244_v7  ;;  %v8290_v8 = vrot.slane %v1855_v2, %v8244_v7 }
 0x3ad   : > { %9394 = vst [vmem:[#allocation11_spill] sm:$0xff] %v8281_v63  ;;  %9395 = vst [vmem:[#allocation12_spill] sm:$0xff] %v8284_v50  ;;  %7314 = vmatmul.mubr.msk.f32.vlgmr.msra.gmra.mxu1 %vm392_vm2, %v2075_v36 }
 0x3ae   : > { %9396 = vst [vmem:[#allocation13_spill] sm:$0xff] %v8287_v5  ;;  %9397 = vst [vmem:[#allocation14_spill] sm:$0xff] %v8290_v8  ;;  %7322 = vmatpush3.xpose.msk.msra.mxu1 %vm392_vm2, %v2233_v45  ;;  %7323 = vmatprep.mubr.msk.f32.mxu1 %vm7825_vm1, %v9363_v12 }
 0x3af   : > { %7331 = vmatprep.subr.mxu1 %v9363_v12 }
 0x3b1   : > { %7324 = vmatmul.mubr.msk.f32.vlgmr.msra.gmra.mxu1 %vm392_vm2, %v2231_v56 }
 0x3b2   : > { %7332 = vmatpush3.xpose.msk.msra.mxu1 %vm392_vm2, %v2389_v15  ;;  %7333 = vmatprep.mubr.msk.f32.mxu1 %vm7825_vm1, %v9363_v12 }
 0x3b3   : > { %7341 = vmatprep.subr.mxu1 %v9363_v12 }
 0x3b5   : > { %7334 = vmatmul.mubr.msk.f32.vlgmr.msra.gmra.mxu1 %vm392_vm2, %v2387_v6 }
 0x3b6   : > { %7343 = vmatprep.mubr.msk.f32.mxu1 %vm7825_vm1, %v9363_v12 }
 0x41c   : > { %v8327_v18 = vpop.f32.mrf.mxu1 }
 0x41d   : > { %9399 = vst [vmem:[#allocation16_spill] sm:$0xff] %v8327_v18 }
 0x41e   : > { %v7265_v21 = vpop.f32.mrf.mxu1 }
 0x420   : > { %v8329_v22 = vpop.f32.mrf.mxu0 }
 0x421   : > { %9400 = vst [vmem:[#allocation17_spill] sm:$0xff] %v8329_v22 }
 0x422   : > { %v7270_v25 = vpop.f32.mrf.mxu0 }
 0x424   : > { %v8331_v27 = vpop.f32.mrf.mxu1 }
 0x425   : > { %9401 = vst [vmem:[#allocation18_spill] sm:$0xff] %v8331_v27 }
 0x426   : > { %v7275_v30 = vpop.f32.mrf.mxu1 }
 0x434   : > { %v8333_v31 = vpop.f32.mrf.mxu0 }
 0x435   : > { %9402 = vst [vmem:[#allocation19_spill] sm:$0xff] %v8333_v31 }
 0x436   : > { %v7280_v32 = vpop.f32.mrf.mxu0 }
 0x438   : > { %v8335_v33 = vpop.f32.mrf.mxu0 }
 0x439   : > { %9403 = vst [vmem:[#allocation20_spill] sm:$0xff] %v8335_v33 }
 0x43a   : > { %v7290_v34 = vpop.f32.mrf.mxu0 }
 0x43c   : > { %v8337_v35 = vpop.f32.mrf.mxu0 }
 0x43d   : > { %9404 = vst [vmem:[#allocation21_spill] sm:$0xff] %v8337_v35 }
 0x43e   : > { %v7300_v36 = vpop.f32.mrf.mxu0 }
 0x440   : > { %v2070_v37 = vpop.f32.mrf.mxu0 }
 0x441   : > { %v2543_v39 = vmul.f32 0.35355338, %v2070_v37 }
 0x442   : > { %v7310_v40 = vpop.f32.mrf.mxu0 }
 0x443   : > { %v8342_v41 = vadd.f32 %v2543_v39, %v386_v38 }
 0x445   : > { %v2561_v42 = vsel %vm392_vm2, %v8342_v41, -inf }
 0x446   : > { %2562 = vmax.xlane.f32.xlu1 %v2561_v42 }
 0x453   : > { %v2226_v43 = vpop.f32.mrf.mxu0 }
 0x454   : > { %v2545_v61 = vmul.f32 0.35355338, %v2226_v43 }
 0x455   : > { %v7320_v44 = vpop.f32.mrf.mxu0 }
 0x456   : > { %v2553_v30 = vadd.f32 %v2545_v61, %v386_v38 }
 0x458   : > { %v2567_v42 = vsel %vm392_vm2, %v2553_v30, -inf }
 0x45b   : > { %v2382_v45 = vpop.f32.mrf.mxu0 }
 0x45c   : > { %v2547_v32 = vmul.f32 0.35355338, %v2382_v45 }
 0x45d   : > { %v7330_v46 = vpop.f32.mrf.mxu0 }
 0x461   : > { %v8346_v47 = vpop.f32.mrf.mxu1 }
 0x462   : > { %9405 = vst [vmem:[#allocation22_spill] sm:$0xff] %v8346_v47 }
 0x463   : > { %v7285_v48 = vpop.f32.mrf.mxu1  ;;  %v2538_v1 = vpop.f32.mrf.mxu0 }
 0x464   : > { %v2549_v43 = vmul.f32 0.35355338, %v2538_v1  ;;  %v2555_v48 = vadd.f32 %v2547_v32, %v386_v38 }
 0x465   : > { %v8348_v49 = vpop.f32.mrf.mxu1  ;;  %v7340_v3 = vpop.f32.mrf.mxu0 }
 0x466   : > { %9406 = vst [vmem:[#allocation23_spill] sm:$0xff] %v8348_v49  ;;  %v2573_v45 = vsel %vm392_vm2, %v2555_v48, -inf }
 0x467   : > { %v7295_v51 = vpop.f32.mrf.mxu1 }
 0x469   : > { %v1992_v53 = vpop.f32.mrf.mxu1 }
 0x46a   : > { %v2542_v55 = vmul.f32 0.35355338, %v1992_v53 }
 0x46b   : > { %v7305_v56 = vpop.f32.mrf.mxu1 }
 0x46c   : > { %v2550_v60 = vadd.f32 %v2542_v55, %v386_v38  ;;  %v2557_v55 = vadd.f32 %v2549_v43, %v386_v38 }
 0x46d   : > { %v2148_v0 = vpop.f32.mrf.mxu1 }
 0x46e   : > { %v2544_v2 = vmul.f32 0.35355338, %v2148_v0  ;;  %v2558_v15 = vsel %vm392_vm2, %v2550_v60, -inf  ;;  %v2579_v56 = vsel %vm392_vm2, %v2557_v55, -inf }
 0x46f   : > { %2559 = vmax.xlane.f32.xlu0 %v2558_v15  ;;  %v7315_v6 = vpop.f32.mrf.mxu1 }
 0x470   : > { %v2552_v21 = vadd.f32 %v2544_v2, %v386_v38 }
 0x471   : > { %v2304_v25 = vpop.f32.mrf.mxu1 }
 0x472   : > { %v2546_v34 = vmul.f32 0.35355338, %v2304_v25  ;;  %v2564_v36 = vsel %vm392_vm2, %v2552_v21, -inf }
 0x473   : > { %2565 = vmax.xlane.f32.xlu0 %v2564_v36  ;;  %v7325_v37 = vpop.f32.mrf.mxu1 }
 0x474   : > { %v2554_v39 = vadd.f32 %v2546_v34, %v386_v38 }
 0x475   : > { %v2460_v40 = vpop.f32.mrf.mxu1 }
 0x476   : > { %v2548_v44 = vmul.f32 0.35355338, %v2460_v40  ;;  %v2570_v46 = vsel %vm392_vm2, %v2554_v39, -inf }
 0x477   : > { %2568 = vmax.xlane.f32.xlu0 %v2567_v42  ;;  %2571 = vmax.xlane.f32.xlu1 %v2570_v46  ;;  %v7335_v3 = vpop.f32.mrf.mxu1 }
 0x478   : > { %v2556_v51 = vadd.f32 %v2548_v44, %v386_v38 }
 0x47a   : > { %v2576_v53 = vsel %vm392_vm2, %v2556_v51, -inf }
 0x47b   : > { %2574 = vmax.xlane.f32.xlu0 %v2573_v45  ;;  %2577 = vmax.xlane.f32.xlu1 %v2576_v53 }
 0x47f   : > { %2580 = vmax.xlane.f32.xlu0 %v2579_v56 }
 0x48c   : > { %2670 = vrot.lane.b32.xlu1 %v7956_v16, %s7832_s12 }
 0x490   : > { %2822 = vrot.lane.b32.xlu1 %v7962_v20, %s7832_s12 }
 0x494   : > { %2898 = vrot.lane.b32.xlu1 %v7968_v23, %s7832_s12 }
 0x495   : > { %2746 = vrot.lane.b32.xlu0 %v7960_v19, %s7832_s12 }
 0x498   : > { %3050 = vrot.lane.b32.xlu1 %v7974_v26, %s7832_s12 }
 0x499   : > { %2974 = vrot.lane.b32.xlu0 %v7970_v24, %s7832_s12 }
 0x49c   : > { %3202 = vrot.lane.b32.xlu1 %v7982_v29, %s7832_s12 }
 0x49d   : > { %3126 = vrot.lane.b32.xlu0 %v7978_v28, %s7832_s12 }
 0x4a0   : > { %3529 = vrot.lane.b32.xlu1 %v7960_v19, %s7833_s13 }
 0x4a1   : > { %3451 = vrot.lane.b32.xlu0 %v7956_v16, %s7833_s13 }
 0x4a4   : > { %3527 = vrot.lane.b32.xlu1 %v7960_v19, %s7834_s14 }
 0x4a5   : > { %3449 = vrot.lane.b32.xlu0 %v7956_v16, %s7834_s14 }
 0x4cf   : > { %v2563_v38 = vpop.xlane.xlu1 %2562 }
 0x4d0   : > { %v2583_v1 = vsub.f32 %v8342_v41, %v2563_v38 }
 0x4d2   : > { %v2592_v61 = vmul.f32 1.442695, %v2583_v1 }
 0x4d4   : > { %7636 = vpow2.f32 %v2592_v61 }
 0x4e1   : > { %v8382_v0 = vpop.eup %7636 }
 0x4e2   : > { %v2609_v2 = vsel %vm392_vm2, %v8382_v0, 0.0 }
 0x4e3   : > { %2610 = vadd.xlane.f32.xlu0 %v2609_v2 }
 0x4f8   : > { %v2560_v15 = vpop.xlane.xlu0 %2559 }
 0x4f9   : > { %v2582_v6 = vsub.f32 %v2550_v60, %v2560_v15 }
 0x4fb   : > { %v2590_v25 = vmul.f32 1.442695, %v2582_v6 }
 0x4fc   : > { %v2566_v32 = vpop.xlane.xlu0 %2565 }
 0x4fd   : > { %7638 = vpow2.f32 %v2590_v25  ;;  %v2584_v34 = vsub.f32 %v2552_v21, %v2566_v32 }
 0x4ff   : > { %v2594_v36 = vmul.f32 1.442695, %v2584_v34 }
 0x500   : > { %v2572_v37 = vpop.xlane.xlu1 %2571  ;;  %v2569_v40 = vpop.xlane.xlu0 %2568 }
 0x501   : > { %7640 = vpow2.f32 %v2594_v36  ;;  %v2586_v42 = vsub.f32 %v2554_v39, %v2572_v37  ;;  %v2585_v41 = vsub.f32 %v2553_v30, %v2569_v40 }
 0x503   : > { %v2598_v43 = vmul.f32 1.442695, %v2586_v42  ;;  %v2596_v44 = vmul.f32 1.442695, %v2585_v41 }
 0x504   : > { %v2578_v46 = vpop.xlane.xlu1 %2577  ;;  %v2575_v3 = vpop.xlane.xlu0 %2574 }
 0x505   : > { %7642 = vpow2.f32 %v2598_v43  ;;  %v2588_v45 = vsub.f32 %v2556_v51, %v2578_v46  ;;  %v2587_v53 = vsub.f32 %v2555_v48, %v2575_v3 }
 0x506   : > { %7644 = vpow2.f32 %v2596_v44 }
 0x507   : > { %v2602_v56 = vmul.f32 1.442695, %v2588_v45  ;;  %v2600_v60 = vmul.f32 1.442695, %v2587_v53 }
 0x508   : > { %v2671_v38 = vpop.permute.xlu1 %2670  ;;  %v2581_v1 = vpop.xlane.xlu0 %2580 }
 0x509   : > { %7646 = vpow2.f32 %v2602_v56  ;;  %v2589_v21 = vsub.f32 %v2557_v55, %v2581_v1  ;;  %7342 = vmatpush3.msra.mxu1 %v2671_v38 }
 0x50a   : > { %v8386_v61 = vpop.eup %7638  ;;  %7648 = vpow2.f32 %v2600_v60  ;;  %7351 = vmatprep.subr.mxu1 %v9363_v12 }
 0x50b   : > { %v2604_v30 = vmul.f32 1.442695, %v2589_v21  ;;  %v2606_v39 = vsel %vm392_vm2, %v8386_v61, 0.0 }
 0x50c   : > { %2607 = vadd.xlane.f32.xlu1 %v2606_v39  ;;  %v2747_v51 = vpop.permute.xlu0 %2746  ;;  %v2823_v45 = vpop.permute.xlu1 %2822 }
 0x50d   : > { %7650 = vpow2.f32 %v2604_v30  ;;  %7347 = vmatpush3.msra.mxu0 %v2747_v51 }
 0x50e   : > { %v8391_v48 = vpop.eup %7640  ;;  %7356 = vmatprep.subr.mxu0 %v9363_v12 }
 0x50f   : > { %v2612_v55 = vsel %vm392_vm2, %v8391_v48, 0.0 }
 0x510   : > { %2613 = vadd.xlane.f32.xlu1 %v2612_v55  ;;  %v8440_v41 = vpop.permute.xlu0 %2974  ;;  %v2899_v53 = vpop.permute.xlu1 %2898 }
 0x512   : > { %v8396_v2 = vpop.eup %7642 }
 0x513   : > { %v8398_v15 = vpop.eup %7644  ;;  %v2618_v6 = vsel %vm392_vm2, %v8396_v2, 0.0 }
 0x514   : > { %2619 = vadd.xlane.f32.xlu1 %v2618_v6  ;;  %v2615_v25 = vsel %vm392_vm2, %v8398_v15, 0.0  ;;  %v8442_v43 = vpop.permute.xlu0 %3126  ;;  %v8448_v1 = vpop.permute.xlu1 %3050 }
 0x515   : > { %2616 = vadd.xlane.f32.xlu0 %v2615_v25 }
 0x516   : > { %v8404_v32 = vpop.eup %7646 }
 0x517   : > { %v8406_v34 = vpop.eup %7648  ;;  %v2624_v36 = vsel %vm392_vm2, %v8404_v32, 0.0 }
 0x518   : > { %2625 = vadd.xlane.f32.xlu1 %v2624_v36  ;;  %v2621_v37 = vsel %vm392_vm2, %v8406_v34, 0.0  ;;  %v8444_v44 = vpop.permute.xlu0 %3451  ;;  %v8457_v39 = vpop.permute.xlu1 %3202 }
 0x519   : > { %2622 = vadd.xlane.f32.xlu0 %v2621_v37 }
 0x51a   : > { %v8412_v40 = vpop.eup %7650 }
 0x51b   : > { %v2627_v42 = vsel %vm392_vm2, %v8412_v40, 0.0 }
 0x51c   : > { %v8446_v46 = vpop.permute.xlu0 %3449  ;;  %v8460_v51 = vpop.permute.xlu1 %3529 }
 0x51d   : > { %2628 = vadd.xlane.f32.xlu0 %v2627_v42 }
 0x520   : > { %v8462_v55 = vpop.permute.xlu1 %3527 }
 0x529   : > { %3685 = vrot.lane.b32.xlu1 %v7968_v23, %s7833_s13 }
 0x52d   : > { %3683 = vrot.lane.b32.xlu1 %v7968_v23, %s7834_s14 }
 0x531   : > { %3841 = vrot.lane.b32.xlu1 %v7974_v26, %s7833_s13 }
 0x533   : > { %3607 = vrot.lane.b32.xlu0 %v7962_v20, %s7833_s13 }
 0x535   : > { %3839 = vrot.lane.b32.xlu1 %v7974_v26, %s7834_s14 }
 0x537   : > { %3605 = vrot.lane.b32.xlu0 %v7962_v20, %s7834_s14 }
 0x539   : > { %3997 = vrot.lane.b32.xlu1 %v7982_v29, %s7833_s13 }
 0x53b   : > { %3763 = vrot.lane.b32.xlu0 %v7970_v24, %s7833_s13 }
 0x53d   : > { %3995 = vrot.lane.b32.xlu1 %v7982_v29, %s7834_s14 }
 0x53f   : > { %3761 = vrot.lane.b32.xlu0 %v7970_v24, %s7834_s14 }
 0x543   : > { %3919 = vrot.lane.b32.xlu0 %v7978_v28, %s7833_s13  ;;  %s7842_s13 = smov 32  }
 0x547   : > { %3917 = vrot.lane.b32.xlu0 %v7978_v28, %s7834_s14 }
 0x56c   : > { %v2611_v3 = vpop.xlane.xlu0 %2610 }
 0x56d   : > { %7652 = vrcp.f32 %v2611_v3 }
 0x57a   : > { %v7653_v56 = vpop.eup %7652 }
 0x57b   : > { %v2639_v60 = vmul.f32 %v7653_v56, %v2611_v3 }
 0x57d   : > { %v2647_v38 = vsub.f32 2.0, %v2639_v60 }
 0x57f   : > { %v2655_v21 = vmul.f32 %v7653_v56, %v2647_v38 }
 0x581   : > { %v8451_v30 = vmul.f32 %v8382_v0, %v2655_v21 }
 0x583   : > { %7349 = vmatmul.mubr.msk.f32.vlgmr.msra.gmra.mxu0 %vm392_vm2, %v8451_v30 }
 0x584   : > { %7357 = vmatpush3.msra.mxu0 %v2899_v53  ;;  %7358 = vmatprep.mubr.msk.f32.mxu0 %vm7825_vm1, %v9363_v12 }
 0x585   : > { %7366 = vmatprep.subr.mxu0 %v9363_v12 }
 0x595   : > { %v2608_v6 = vpop.xlane.xlu1 %2607 }
 0x596   : > { %7654 = vrcp.f32 %v2608_v6 }
 0x599   : > { %v2614_v25 = vpop.xlane.xlu1 %2613 }
 0x59a   : > { %7656 = vrcp.f32 %v2614_v25 }
 0x59d   : > { %v2620_v0 = vpop.xlane.xlu1 %2619 }
 0x59e   : > { %7658 = vrcp.f32 %v2620_v0  ;;  %v2617_v36 = vpop.xlane.xlu0 %2616 }
 0x59f   : > { %7660 = vrcp.f32 %v2617_v36 }
 0x5a1   : > { %v2626_v37 = vpop.xlane.xlu1 %2625 }
 0x5a2   : > { %7662 = vrcp.f32 %v2626_v37  ;;  %v2623_v42 = vpop.xlane.xlu0 %2622 }
 0x5a3   : > { %v7655_v3 = vpop.eup %7654  ;;  %7664 = vrcp.f32 %v2623_v42 }
 0x5a4   : > { %v2638_v53 = vmul.f32 %v7655_v3, %v2608_v6  ;;  %v9407_v6 = vmov 0.0  }
 0x5a6   : > { %v2646_v56 = vsub.f32 2.0, %v2638_v53  ;;  %v2629_v60 = vpop.xlane.xlu0 %2628 }
 0x5a7   : > { %v7657_v38 = vpop.eup %7656  ;;  %7666 = vrcp.f32 %v2629_v60 }
 0x5a8   : > { %v2654_v21 = vmul.f32 %v7655_v3, %v2646_v56  ;;  %v2640_v17 = vmul.f32 %v7657_v38, %v2614_v25  ;;  %v8471_v25 = vpop.permute.xlu1 %3685 }
 0x5aa   : > { %v2662_v14 = vmul.f32 %v8386_v61, %v2654_v21  ;;  %v2648_v10 = vsub.f32 2.0, %v2640_v17  ;;  %v8465_v9 = vpop.permute.xlu0 %3607 }
 0x5ab   : > { %v7659_v13 = vpop.eup %7658 }
 0x5ac   : > { %v7661_v11 = vpop.eup %7660  ;;  %v2656_v58 = vmul.f32 %v7657_v38, %v2648_v10  ;;  %v2642_v54 = vmul.f32 %v7659_v13, %v2620_v0  ;;  %7344 = vmatmul.mubr.msk.f32.vlgmr.msra.gmra.mxu1 %vm392_vm2, %v2662_v14 }
 0x5ad   : > { %v2641_v12 = vmul.f32 %v7661_v11, %v2617_v36  ;;  %7352 = vmatpush3.msra.mxu1 %v2823_v45  ;;  %7353 = vmatprep.mubr.msk.f32.mxu1 %vm7825_vm1, %v9407_v6 }
 0x5ae   : > { %v2664_v53 = vmul.f32 %v8391_v48, %v2656_v58  ;;  %v2650_v3 = vsub.f32 2.0, %v2642_v54  ;;  %7361 = vmatprep.subr.mxu1 %v9407_v6  ;;  %v8474_v35 = vpop.permute.xlu0 %3605 }
 0x5af   : > { %v7663_v17 = vpop.eup %7662  ;;  %v2649_v61 = vsub.f32 2.0, %v2641_v12 }
 0x5b0   : > { %v7665_v56 = vpop.eup %7664  ;;  %v3278_v21 = vcombine.low %v2662_v14, %v2664_v53  ;;  %v3279_v10 = vcombine.high %v2662_v14, %v2664_v53  ;;  %v2658_v0 = vmul.f32 %v7659_v13, %v2650_v3  ;;  %v2644_v38 = vmul.f32 %v7663_v17, %v2626_v37  ;;  %7354 = vmatmul.mubr.msk.f32.vlgmr.msra.gmra.mxu1 %vm392_vm2, %v2664_v53  ;;  %v8483_v37 = vpop.permute.xlu1 %3683 }
 0x5b1   : > { %v2657_v45 = vmul.f32 %v7661_v11, %v2649_v61  ;;  %v2643_v36 = vmul.f32 %v7665_v56, %v2623_v42  ;;  %7362 = vmatpush3.msra.mxu1 %v8440_v41  ;;  %7363 = vmatprep.mubr.msk.f32.mxu1 %vm7825_vm1, %v9407_v6 }
 0x5b2   : > { %v2666_v54 = vmul.f32 %v8396_v2, %v2658_v0  ;;  %v2652_v58 = vsub.f32 2.0, %v2644_v38  ;;  %7371 = vmatprep.subr.mxu1 %v9407_v6  ;;  %v3764_v3 = vpop.permute.xlu0 %3763 }
 0x5b3   : > { %v2665_v12 = vmul.f32 %v8398_v15, %v2657_v45  ;;  %v2651_v13 = vsub.f32 2.0, %v2643_v36  ;;  %v3286_v15 = vrot.slane %v3278_v21, %v8175_v4 }
 0x5b4   : > { %v7667_v14 = vpop.eup %7666  ;;  %v2660_v48 = vmul.f32 %v7663_v17, %v2652_v58  ;;  %7364 = vmatmul.mubr.msk.f32.vlgmr.msra.gmra.mxu1 %vm392_vm2, %v2666_v54  ;;  %v3842_v0 = vpop.permute.xlu1 %3841 }
 0x5b5   : > { %v3294_v11 = vcombine.low %v8451_v30, %v2665_v12  ;;  %v3295_v41 = vcombine.high %v8451_v30, %v2665_v12  ;;  %v2659_v42 = vmul.f32 %v7665_v56, %v2651_v13  ;;  %v2645_v53 = vmul.f32 %v7667_v14, %v2629_v60  ;;  %7359 = vmatmul.mubr.msk.f32.vlgmr.msra.gmra.mxu0 %vm392_vm2, %v2665_v12 }
 0x5b6   : > { %v2668_v2 = vmul.f32 %v8404_v32, %v2660_v48  ;;  %7367 = vmatpush3.msra.mxu0 %v8448_v1  ;;  %7372 = vmatpush3.msra.mxu1 %v8442_v43  ;;  %v3293_v43 = vrot.slane %v3279_v10, %v8175_v4  ;;  %v3762_v10 = vpop.permute.xlu0 %3761 }
 0x5b7   : > { %v2667_v17 = vmul.f32 %v8406_v34, %v2659_v42  ;;  %v2653_v61 = vsub.f32 2.0, %v2645_v53  ;;  %7368 = vmatprep.mubr.msk.f32.mxu0 %vm7825_vm1, %v9407_v6  ;;  %7373 = vmatprep.mubr.msk.f32.mxu1 %vm7825_vm1, %v9407_v6  ;;  %v3302_v30 = vrot.slane %v3294_v11, %v8175_v4  ;;  %v3309_v32 = vrot.slane %v3295_v41, %v8175_v4 }
 0x5b8   : > { %v3310_v60 = vcombine.low %v2666_v54, %v2668_v2  ;;  %v3311_v56 = vcombine.high %v2666_v54, %v2668_v2  ;;  %7376 = vmatprep.subr.mxu0 %v9407_v6  ;;  %7381 = vmatprep.subr.mxu1 %v9407_v6  ;;  %v3840_v12 = vpop.permute.xlu1 %3839 }
 0x5b9   : > { %v2661_v34 = vmul.f32 %v7667_v14, %v2653_v61  ;;  %7369 = vmatmul.mubr.msk.f32.vlgmr.msra.gmra.mxu0 %vm392_vm2, %v2667_v17  ;;  %7374 = vmatmul.mubr.msk.f32.vlgmr.msra.gmra.mxu1 %vm392_vm2, %v2668_v2  ;;  %v3342_v1 = vcombine.low %v3286_v15, %v3302_v30  ;;  %v3343_v21 = vcombine.high %v3286_v15, %v3302_v30 }
 0x5ba   : > { %7377 = vmatpush3.msra.mxu0 %v8457_v39  ;;  %7382 = vmatpush3.xpose.msk.msra.mxu1 %vm392_vm2, %v8444_v44  ;;  %v3358_v38 = vcombine.low %v3293_v43, %v3309_v32  ;;  %v3359_v36 = vcombine.high %v3293_v43, %v3309_v32  ;;  %v3325_v58 = vrot.slane %v3311_v56, %v8175_v4  ;;  %v3920_v14 = vpop.permute.xlu0 %3919 }
 0x5bb   : > { %v2669_v45 = vmul.f32 %v8412_v40, %v2661_v34  ;;  %7378 = vmatprep.mubr.msk.f32.mxu0 %vm7825_vm1, %v9407_v6  ;;  %7383 = vmatprep.mubr.msk.f32.mxu1 %vm7825_vm1, %v9407_v6  ;;  %v3318_v40 = vrot.slane %v3310_v60, %v8175_v4  ;;  %v8540_v48 = vrot.slane %v3342_v1, %v8244_v7 }
 0x5bc   : > { %7386 = vmatprep.subr.mxu0 %v9407_v6  ;;  %7391 = vmatprep.subr.mxu1 %v9407_v6  ;;  %v8543_v11 = vrot.slane %v3343_v21, %v8244_v7  ;;  %v8561_v42 = vrot.slane %v3358_v38, %v8244_v7  ;;  %v8564_v53 = vrot.slane %v3359_v36, %v8244_v7  ;;  %v3998_v61 = vpop.permute.xlu1 %3997 }
 0x5bd   : > { %v3326_v54 = vcombine.low %v2667_v17, %v2669_v45  ;;  %v3327_v39 = vcombine.high %v2667_v17, %v2669_v45  ;;  %7379 = vmatmul.mubr.msk.f32.vlgmr.msra.gmra.mxu0 %vm392_vm2, %v2669_v45  ;;  %7384 = vmatmul.mubr.msk.f32.vlgmr.msra.gmra.mxu1 %vm392_vm2, %v8446_v46 }
 0x5be   : > { %7387 = vmatpush3.xpose.msk.msra.mxu0 %vm392_vm2, %v8460_v51  ;;  %7392 = vmatpush3.xpose.msk.msra.mxu1 %vm392_vm2, %v8465_v9  ;;  %9409 = vst [vmem:[#allocation25_spill] sm:$0xff] %v8561_v42  ;;  %9410 = vst [vmem:[#allocation26_spill] sm:$0xff] %v8564_v53  ;;  %v3918_v43 = vpop.permute.xlu0 %3917 }
 0x5bf   : > { %7388 = vmatprep.mubr.msk.f32.mxu0 %vm7825_vm1, %v9407_v6  ;;  %7393 = vmatprep.mubr.msk.f32.mxu1 %vm7825_vm1, %v9407_v6  ;;  %v3334_v44 = vrot.slane %v3326_v54, %v8175_v4  ;;  %v3341_v46 = vrot.slane %v3327_v39, %v8175_v4 }
 0x5c0   : > { %7396 = vmatprep.subr.mxu0 %v9407_v6  ;;  %7401 = vmatprep.subr.mxu1 %v9407_v6  ;;  %v3996_v34 = vpop.permute.xlu1 %3995 }
 0x5c1   : > { %7389 = vmatmul.mubr.msk.f32.vlgmr.msra.gmra.mxu0 %vm392_vm2, %v8462_v55  ;;  %7394 = vmatmul.mubr.msk.f32.vlgmr.msra.gmra.mxu1 %vm392_vm2, %v8474_v35  ;;  %v3374_v9 = vcombine.low %v3318_v40, %v3334_v44  ;;  %v3375_v51 = vcombine.high %v3318_v40, %v3334_v44  ;;  %v3390_v13 = vcombine.low %v3325_v58, %v3341_v46 }
 0x5c2   : > { %7397 = vmatpush3.xpose.msk.msra.mxu0 %vm392_vm2, %v8471_v25  ;;  %7402 = vmatpush3.xpose.msk.msra.mxu1 %vm392_vm2, %v3764_v3  ;;  %v3391_v41 = vcombine.high %v3325_v58, %v3341_v46 }
 0x5c3   : > { %7398 = vmatprep.mubr.msk.f32.mxu0 %vm7825_vm1, %v9407_v6  ;;  %7403 = vmatprep.mubr.msk.f32.mxu1 %vm7825_vm1, %v9407_v6  ;;  %v8550_v35 = vrot.slane %v3374_v9, %v8244_v7  ;;  %v8553_v55 = vrot.slane %v3375_v51, %v8244_v7  ;;  %v8556_v25 = vrot.slane %v3390_v13, %v8244_v7  ;;  %v387_v13 = vld [vmem:[%s9360_s3 + $0x10] sm:$0xff] }
 0x5c4   : > { %7406 = vmatprep.subr.mxu0 %v9407_v6  ;;  %7411 = vmatprep.subr.mxu1 %v9407_v6  ;;  %v8567_v2 = vrot.slane %v3391_v41, %v8244_v7 }
 0x5c5   : > { %9408 = vst [vmem:[#allocation24_spill] sm:$0xff] %v8556_v25  ;;  %7399 = vmatmul.mubr.msk.f32.vlgmr.msra.gmra.mxu0 %vm392_vm2, %v8483_v37  ;;  %7404 = vmatmul.mubr.msk.f32.vlgmr.msra.gmra.mxu1 %vm392_vm2, %v3762_v10 }
 0x5c6   : > { %9411 = vst [vmem:[#allocation27_spill] sm:$0xff] %v8567_v2  ;;  %7407 = vmatpush3.xpose.msk.msra.mxu0 %vm392_vm2, %v3842_v0  ;;  %7412 = vmatpush3.xpose.msk.msra.mxu1 %vm392_vm2, %v3920_v14 }
 0x5c7   : > { %7408 = vmatprep.mubr.msk.f32.mxu0 %vm7825_vm1, %v9407_v6  ;;  %7413 = vmatprep.mubr.msk.f32.mxu1 %vm7825_vm1, %v9407_v6 }
 0x5c8   : > { %7416 = vmatprep.subr.mxu0 %v9407_v6  ;;  %7421 = vmatprep.subr.mxu1 %v9407_v6 }
 0x5c9   : > { %7409 = vmatmul.mubr.msk.f32.vlgmr.msra.gmra.mxu0 %vm392_vm2, %v3840_v12  ;;  %7414 = vmatmul.mubr.msk.f32.vlgmr.msra.gmra.mxu1 %vm392_vm2, %v3918_v43 }
 0x5ca   : > { %7417 = vmatpush3.xpose.msk.msra.mxu0 %vm392_vm2, %v3998_v61  ;;  %7418 = vmatprep.mubr.msk.f32.mxu0 %vm7825_vm1, %v9407_v6 }
 0x5cb   : > { %7426 = vmatprep.subr.mxu0 %v9407_v6  ;;  %7423 = vmatprep.mubr.msk.f32.mxu1 %vm7825_vm1, %v9407_v6 }
 0x5cd   : > { %7419 = vmatmul.mubr.msk.f32.vlgmr.msra.gmra.mxu0 %vm392_vm2, %v3996_v34 }
 0x5ce   : > { %7428 = vmatprep.mubr.msk.f32.mxu0 %vm7825_vm1, %v9407_v6 }
 0x643   : > { %v8607_v1 = vpop.f32.mrf.mxu0 }
 0x645   : > { %v7350_v21 = vpop.f32.mrf.mxu0 }
 0x66c   : > { %v8609_v0 = vpop.f32.mrf.mxu1 }
 0x66e   : > { %v7345_v38 = vpop.f32.mrf.mxu1 }
 0x670   : > { %v8611_v45 = vpop.f32.mrf.mxu1 }
 0x672   : > { %v7355_v10 = vpop.f32.mrf.mxu1 }
 0x674   : > { %v8613_v36 = vpop.f32.mrf.mxu1 }
 0x675   : > { %v8615_v54 = vpop.f32.mrf.mxu0 }
 0x676   : > { %v7365_v39 = vpop.f32.mrf.mxu1 }
 0x677   : > { %v7360_v40 = vpop.f32.mrf.mxu0 }
 0x679   : > { %v8617_v44 = vpop.f32.mrf.mxu0  ;;  %v8619_v58 = vpop.f32.mrf.mxu1 }
 0x67b   : > { %v7370_v46 = vpop.f32.mrf.mxu0  ;;  %v7375_v12 = vpop.f32.mrf.mxu1 }
 0x67d   : > { %v8621_v9 = vpop.f32.mrf.mxu0  ;;  %v3523_v51 = vpop.f32.mrf.mxu1 }
 0x67e   : > { %v4073_v14 = vmul.f32 0.35355338, %v3523_v51 }
 0x67f   : > { %v7380_v41 = vpop.f32.mrf.mxu0  ;;  %v7385_v61 = vpop.f32.mrf.mxu1 }
 0x680   : > { %v4081_v43 = vadd.f32 %v4073_v14, %v387_v13 }
 0x681   : > { %v3601_v34 = vpop.f32.mrf.mxu0  ;;  %v3679_v21 = vpop.f32.mrf.mxu1 }
 0x682   : > { %v4074_v38 = vmul.f32 0.35355338, %v3601_v34  ;;  %v4075_v10 = vmul.f32 0.35355338, %v3679_v21  ;;  %v4089_v39 = vsel %vm392_vm2, %v4081_v43, -inf }
 0x683   : > { %4090 = vmax.xlane.f32.xlu0 %v4089_v39  ;;  %v7390_v40 = vpop.f32.mrf.mxu0  ;;  %v7395_v46 = vpop.f32.mrf.mxu1 }
 0x684   : > { %v4082_v12 = vadd.f32 %v4074_v38, %v387_v13  ;;  %v4083_v37 = vadd.f32 %v4075_v10, %v387_v13 }
 0x685   : > { %v3757_v56 = vpop.f32.mrf.mxu0  ;;  %v3835_v60 = vpop.f32.mrf.mxu1 }
 0x686   : > { %v4076_v32 = vmul.f32 0.35355338, %v3757_v56  ;;  %v4077_v30 = vmul.f32 0.35355338, %v3835_v60  ;;  %v4092_v51 = vsel %vm392_vm2, %v4082_v12, -inf  ;;  %v4095_v41 = vsel %vm392_vm2, %v4083_v37, -inf }
 0x687   : > { %4093 = vmax.xlane.f32.xlu1 %v4092_v51  ;;  %v7400_v14 = vpop.f32.mrf.mxu0  ;;  %4096 = vmax.xlane.f32.xlu0 %v4095_v41  ;;  %v7405_v61 = vpop.f32.mrf.mxu1 }
 0x688   : > { %v4084_v34 = vadd.f32 %v4076_v32, %v387_v13  ;;  %v4085_v21 = vadd.f32 %v4077_v30, %v387_v13 }
 0x689   : > { %v3913_v17 = vpop.f32.mrf.mxu0  ;;  %v3991_v39 = vpop.f32.mrf.mxu1 }
 0x68a   : > { %v4078_v40 = vmul.f32 0.35355338, %v3913_v17  ;;  %v4079_v46 = vmul.f32 0.35355338, %v3991_v39  ;;  %v4098_v38 = vsel %vm392_vm2, %v4084_v34, -inf  ;;  %v4101_v10 = vsel %vm392_vm2, %v4085_v21, -inf }
 0x68b   : > { %v7410_v56 = vpop.f32.mrf.mxu0  ;;  %4099 = vmax.xlane.f32.xlu0 %v4098_v38  ;;  %4102 = vmax.xlane.f32.xlu1 %v4101_v10  ;;  %v7415_v60 = vpop.f32.mrf.mxu1 }
 0x68c   : > { %v4086_v15 = vadd.f32 %v4078_v40, %v387_v13  ;;  %v4087_v3 = vadd.f32 %v4079_v46, %v387_v13 }
 0x68d   : > { %v4069_v51 = vpop.f32.mrf.mxu0 }
 0x68e   : > { %v4080_v14 = vmul.f32 0.35355338, %v4069_v51  ;;  %v4104_v41 = vsel %vm392_vm2, %v4086_v15, -inf  ;;  %v4107_v30 = vsel %vm392_vm2, %v4087_v3, -inf }
 0x68f   : > { %v7420_v32 = vpop.f32.mrf.mxu0  ;;  %4105 = vmax.xlane.f32.xlu0 %v4104_v41  ;;  %4108 = vmax.xlane.f32.xlu1 %v4107_v30 }
 0x690   : > { %v4088_v17 = vadd.f32 %v4080_v14, %v387_v13 }
 0x692   : > { %v4110_v61 = vsel %vm392_vm2, %v4088_v17, -inf }
 0x693   : > { %4111 = vmax.xlane.f32.xlu0 %v4110_v61 }
 0x6a0   : > { %4201 = vrot.lane.b32.xlu1 %v7956_v16, %s7835_s17 }
 0x6a4   : > { %4353 = vrot.lane.b32.xlu1 %v7962_v20, %s7835_s17 }
 0x6a8   : > { %4429 = vrot.lane.b32.xlu1 %v7968_v23, %s7835_s17 }
 0x6a9   : > { %4277 = vrot.lane.b32.xlu0 %v7960_v19, %s7835_s17 }
 0x6ac   : > { %4581 = vrot.lane.b32.xlu1 %v7974_v26, %s7835_s17 }
 0x6ad   : > { %4505 = vrot.lane.b32.xlu0 %v7970_v24, %s7835_s17 }
 0x6b0   : > { %4733 = vrot.lane.b32.xlu1 %v7982_v29, %s7835_s17 }
 0x6b1   : > { %4657 = vrot.lane.b32.xlu0 %v7978_v28, %s7835_s17 }
 0x6b4   : > { %5060 = vrot.lane.b32.xlu1 %v7960_v19, %s7836_s23 }
 0x6b5   : > { %4982 = vrot.lane.b32.xlu0 %v7956_v16, %s7836_s23 }
 0x6b8   : > { %5058 = vrot.lane.b32.xlu1 %v7960_v19, %s7837_s25 }
 0x6b9   : > { %4980 = vrot.lane.b32.xlu0 %v7956_v16, %s7837_s25 }
 0x70c   : > { %v4091_v13 = vpop.xlane.xlu0 %4090 }
 0x70d   : > { %v4113_v39 = vsub.f32 %v4081_v43, %v4091_v13 }
 0x70f   : > { %v4121_v40 = vmul.f32 1.442695, %v4113_v39 }
 0x710   : > { %v4094_v46 = vpop.xlane.xlu1 %4093  ;;  %v4097_v38 = vpop.xlane.xlu0 %4096 }
 0x711   : > { %7668 = vpow2.f32 %v4121_v40  ;;  %v4114_v10 = vsub.f32 %v4082_v12, %v4094_v46  ;;  %v4115_v56 = vsub.f32 %v4083_v37, %v4097_v38 }
 0x713   : > { %v4123_v60 = vmul.f32 1.442695, %v4114_v10  ;;  %v4125_v51 = vmul.f32 1.442695, %v4115_v56 }
 0x714   : > { %v4103_v14 = vpop.xlane.xlu1 %4102  ;;  %v4100_v41 = vpop.xlane.xlu0 %4099 }
 0x715   : > { %7670 = vpow2.f32 %v4123_v60  ;;  %v4117_v30 = vsub.f32 %v4085_v21, %v4103_v14  ;;  %v4116_v32 = vsub.f32 %v4084_v34, %v4100_v41 }
 0x716   : > { %7672 = vpow2.f32 %v4125_v51 }
 0x717   : > { %v4129_v61 = vmul.f32 1.442695, %v4117_v30  ;;  %v4127_v33 = vmul.f32 1.442695, %v4116_v32 }
 0x718   : > { %v4109_v47 = vpop.xlane.xlu1 %4108  ;;  %v4106_v49 = vpop.xlane.xlu0 %4105 }
 0x719   : > { %7674 = vpow2.f32 %v4129_v61  ;;  %v4119_v43 = vsub.f32 %v4087_v3, %v4109_v47  ;;  %v4118_v13 = vsub.f32 %v4086_v15, %v4106_v49 }
 0x71a   : > { %7676 = vpow2.f32 %v4127_v33 }
 0x71b   : > { %v4133_v39 = vmul.f32 1.442695, %v4119_v43  ;;  %v4131_v40 = vmul.f32 1.442695, %v4118_v13 }
 0x71c   : > { %v4202_v12 = vpop.permute.xlu1 %4201  ;;  %v4112_v37 = vpop.xlane.xlu0 %4111 }
 0x71d   : > { %7678 = vpow2.f32 %v4133_v39  ;;  %v4120_v46 = vsub.f32 %v4088_v17, %v4112_v37  ;;  %7422 = vmatpush3.msra.mxu1 %v4202_v12 }
 0x71e   : > { %v8658_v38 = vpop.eup %7668  ;;  %7680 = vpow2.f32 %v4131_v40  ;;  %7431 = vmatprep.subr.mxu1 %v9407_v6 }
 0x71f   : > { %v4135_v34 = vmul.f32 1.442695, %v4120_v46  ;;  %v4137_v21 = vsel %vm392_vm2, %v8658_v38, 0.0 }
 0x720   : > { %4138 = vadd.xlane.f32.xlu1 %v4137_v21  ;;  %v4278_v47 = vpop.permute.xlu0 %4277  ;;  %v4354_v43 = vpop.permute.xlu1 %4353 }
 0x721   : > { %7682 = vpow2.f32 %v4135_v34  ;;  %7427 = vmatpush3.msra.mxu0 %v4278_v47 }
 0x722   : > { %v8663_v33 = vpop.eup %7670  ;;  %7436 = vmatprep.subr.mxu0 %v9407_v6 }
 0x723   : > { %v8666_v49 = vpop.eup %7672  ;;  %v4140_v3 = vsel %vm392_vm2, %v8663_v33, 0.0 }
 0x724   : > { %4141 = vadd.xlane.f32.xlu0 %v4140_v3  ;;  %v4143_v15 = vsel %vm392_vm2, %v8666_v49, 0.0  ;;  %v8716_v13 = vpop.permute.xlu1 %4429  ;;  %v4506_v40 = vpop.permute.xlu0 %4505 }
 0x725   : > { %4144 = vadd.xlane.f32.xlu1 %v4143_v15 }
 0x726   : > { %v8672_v17 = vpop.eup %7674 }
 0x727   : > { %v8674_v10 = vpop.eup %7676  ;;  %v4149_v56 = vsel %vm392_vm2, %v8672_v17, 0.0 }
 0x728   : > { %v4146_v60 = vsel %vm392_vm2, %v8674_v10, 0.0  ;;  %v8718_v39 = vpop.permute.xlu1 %4581  ;;  %v8722_v37 = vpop.permute.xlu0 %4657 }
 0x729   : > { %4150 = vadd.xlane.f32.xlu1 %v4149_v56  ;;  %4147 = vadd.xlane.f32.xlu0 %v4146_v60 }
 0x72a   : > { %v8680_v51 = vpop.eup %7678 }
 0x72b   : > { %v8682_v14 = vpop.eup %7680  ;;  %v4155_v41 = vsel %vm392_vm2, %v8680_v51, 0.0 }
 0x72c   : > { %v4152_v30 = vsel %vm392_vm2, %v8682_v14, 0.0  ;;  %v8720_v12 = vpop.permute.xlu1 %4733  ;;  %v8726_v34 = vpop.permute.xlu0 %4982 }
 0x72d   : > { %4156 = vadd.xlane.f32.xlu1 %v4155_v41  ;;  %4153 = vadd.xlane.f32.xlu0 %v4152_v30 }
 0x72e   : > { %v8688_v32 = vpop.eup %7682 }
 0x72f   : > { %v4158_v61 = vsel %vm392_vm2, %v8688_v32, 0.0 }
 0x730   : > { %v8724_v46 = vpop.permute.xlu1 %5060  ;;  %v8730_v47 = vpop.permute.xlu0 %4980 }
 0x731   : > { %4159 = vadd.xlane.f32.xlu0 %v4158_v61 }
 0x734   : > { %v8728_v21 = vpop.permute.xlu1 %5058 }
 0x73e   : > { %5216 = vrot.lane.b32.xlu1 %v7968_v23, %s7836_s23 }
 0x742   : > { %5214 = vrot.lane.b32.xlu1 %v7968_v23, %s7837_s25 }
 0x746   : > { %5372 = vrot.lane.b32.xlu1 %v7974_v26, %s7836_s23 }
 0x747   : > { %5138 = vrot.lane.b32.xlu0 %v7962_v20, %s7836_s23 }
 0x74a   : > { %5370 = vrot.lane.b32.xlu1 %v7974_v26, %s7837_s25 }
 0x74b   : > { %5136 = vrot.lane.b32.xlu0 %v7962_v20, %s7837_s25 }
 0x74e   : > { %5528 = vrot.lane.b32.xlu1 %v7982_v29, %s7836_s23 }
 0x74f   : > { %5294 = vrot.lane.b32.xlu0 %v7970_v24, %s7836_s23 }
 0x752   : > { %5526 = vrot.lane.b32.xlu1 %v7982_v29, %s7837_s25 }
 0x753   : > { %5292 = vrot.lane.b32.xlu0 %v7970_v24, %s7837_s25 }
 0x757   : > { %5450 = vrot.lane.b32.xlu0 %v7978_v28, %s7836_s23 }
 0x75b   : > { %5448 = vrot.lane.b32.xlu0 %v7978_v28, %s7837_s25 }
 0x7a9   : > { %v4139_v3 = vpop.xlane.xlu1 %4138 }
 0x7aa   : > { %7684 = vrcp.f32 %v4139_v3 }
 0x7ad   : > { %v4142_v15 = vpop.xlane.xlu0 %4141 }
 0x7ae   : > { %v4145_v56 = vpop.xlane.xlu1 %4144  ;;  %7686 = vrcp.f32 %v4142_v15 }
 0x7af   : > { %7688 = vrcp.f32 %v4145_v56 }
 0x7b2   : > { %v4151_v60 = vpop.xlane.xlu1 %4150  ;;  %v4148_v41 = vpop.xlane.xlu0 %4147 }
 0x7b3   : > { %7690 = vrcp.f32 %v4151_v60 }
 0x7b4   : > { %7692 = vrcp.f32 %v4148_v41 }
 0x7b6   : > { %v4157_v30 = vpop.xlane.xlu1 %4156  ;;  %v4154_v61 = vpop.xlane.xlu0 %4153 }
 0x7b7   : > { %v7685_v18 = vpop.eup %7684  ;;  %7694 = vrcp.f32 %v4157_v30 }
 0x7b8   : > { %v4169_v27 = vmul.f32 %v7685_v18, %v4139_v3  ;;  %7696 = vrcp.f32 %v4154_v61 }
 0x7ba   : > { %v4177_v22 = vsub.f32 2.0, %v4169_v27  ;;  %v4160_v31 = vpop.xlane.xlu0 %4159 }
 0x7bb   : > { %v7687_v8 = vpop.eup %7686  ;;  %7698 = vrcp.f32 %v4160_v31 }
 0x7bc   : > { %v7689_v52 = vpop.eup %7688  ;;  %v4185_v5 = vmul.f32 %v7685_v18, %v4177_v22  ;;  %v4170_v59 = vmul.f32 %v7687_v8, %v4142_v15 }
 0x7bd   : > { %v4171_v50 = vmul.f32 %v7689_v52, %v4145_v56 }
 0x7be   : > { %v4193_v57 = vmul.f32 %v8658_v38, %v4185_v5  ;;  %v4178_v63 = vsub.f32 2.0, %v4170_v59  ;;  %v8733_v62 = vpop.permute.xlu0 %5138 }
 0x7bf   : > { %v4179_v2 = vsub.f32 2.0, %v4171_v50  ;;  %v8741_v50 = vpop.permute.xlu1 %5216 }
 0x7c0   : > { %v7691_v53 = vpop.eup %7690  ;;  %v4186_v25 = vmul.f32 %v7687_v8, %v4178_v63  ;;  %7424 = vmatmul.mubr.msk.f32.vlgmr.msra.gmra.mxu1 %vm392_vm2, %v4193_v57 }
 0x7c1   : > { %v7693_v3 = vpop.eup %7692  ;;  %v4187_v42 = vmul.f32 %v7689_v52, %v4179_v2  ;;  %v4173_v27 = vmul.f32 %v7691_v53, %v4151_v60  ;;  %7432 = vmatpush3.msra.mxu1 %v4354_v43  ;;  %7433 = vmatprep.mubr.msk.f32.mxu1 %vm7825_vm1, %v9407_v6 }
 0x7c2   : > { %v4194_v18 = vmul.f32 %v8663_v33, %v4186_v25  ;;  %v4172_v22 = vmul.f32 %v7693_v3, %v4148_v41  ;;  %7441 = vmatprep.subr.mxu1 %v9407_v6  ;;  %v8743_v38 = vpop.permute.xlu0 %5136 }
 0x7c3   : > { %v4195_v59 = vmul.f32 %v8666_v49, %v4187_v42  ;;  %v4181_v5 = vsub.f32 2.0, %v4173_v27 }
 0x7c4   : > { %v7695_v63 = vpop.eup %7694  ;;  %v4180_v8 = vsub.f32 2.0, %v4172_v22  ;;  %7429 = vmatmul.mubr.msk.f32.vlgmr.msra.gmra.mxu0 %vm392_vm2, %v4194_v18 }
 0x7c5   : > { %v7697_v52 = vpop.eup %7696  ;;  %v4809_v2 = vcombine.low %v4193_v57, %v4195_v59  ;;  %v4810_v43 = vcombine.high %v4193_v57, %v4195_v59  ;;  %v4189_v15 = vmul.f32 %v7691_v53, %v4181_v5  ;;  %v4175_v56 = vmul.f32 %v7695_v63, %v4157_v30  ;;  %7434 = vmatmul.mubr.msk.f32.vlgmr.msra.gmra.mxu1 %vm392_vm2, %v4195_v59 }
 0x7c6   : > { %v4188_v25 = vmul.f32 %v7693_v3, %v4180_v8  ;;  %v4174_v33 = vmul.f32 %v7697_v52, %v4154_v61  ;;  %7437 = vmatpush3.msra.mxu0 %v8716_v13  ;;  %7442 = vmatpush3.msra.mxu1 %v4506_v40  ;;  %v8756_v40 = vpop.permute.xlu1 %5214  ;;  %v5295_v3 = vpop.permute.xlu0 %5294 }
 0x7c7   : > { %v4197_v42 = vmul.f32 %v8672_v17, %v4189_v15  ;;  %v4183_v49 = vsub.f32 2.0, %v4175_v56  ;;  %7438 = vmatprep.mubr.msk.f32.mxu0 %vm7825_vm1, %v9407_v6  ;;  %7443 = vmatprep.mubr.msk.f32.mxu1 %vm7825_vm1, %v9407_v6  ;;  %v4824_v22 = vrot.slane %v4810_v43, %v8175_v4 }
 0x7c8   : > { %v7699_v60 = vpop.eup %7698  ;;  %v4196_v57 = vmul.f32 %v8674_v10, %v4188_v25  ;;  %v4182_v53 = vsub.f32 2.0, %v4174_v33  ;;  %7446 = vmatprep.subr.mxu0 %v9407_v6  ;;  %7451 = vmatprep.subr.mxu1 %v9407_v6 }
 0x7c9   : > { %v4191_v41 = vmul.f32 %v7695_v63, %v4183_v49  ;;  %v4176_v13 = vmul.f32 %v7699_v60, %v4160_v31  ;;  %7444 = vmatmul.mubr.msk.f32.vlgmr.msra.gmra.mxu1 %vm392_vm2, %v4197_v42  ;;  %v4817_v31 = vrot.slane %v4809_v2, %v8175_v4 }
 0x7ca   : > { %v4825_v17 = vcombine.low %v4194_v18, %v4196_v57  ;;  %v4826_v30 = vcombine.high %v4194_v18, %v4196_v57  ;;  %v4190_v61 = vmul.f32 %v7697_v52, %v4182_v53  ;;  %7439 = vmatmul.mubr.msk.f32.vlgmr.msra.gmra.mxu0 %vm392_vm2, %v4196_v57  ;;  %7452 = vmatpush3.msra.mxu1 %v8722_v37  ;;  %v5373_v2 = vpop.permute.xlu1 %5372  ;;  %v5293_v43 = vpop.permute.xlu0 %5292 }
 0x7cb   : > { %v4199_v10 = vmul.f32 %v8680_v51, %v4191_v41  ;;  %v4184_v27 = vsub.f32 2.0, %v4176_v13  ;;  %7447 = vmatpush3.msra.mxu0 %v8718_v39  ;;  %7448 = vmatprep.mubr.msk.f32.mxu0 %vm7825_vm1, %v9407_v6 }
 0x7cc   : > { %v4198_v18 = vmul.f32 %v8682_v14, %v4190_v61  ;;  %7453 = vmatprep.mubr.msk.f32.mxu1 %vm7825_vm1, %v9407_v6  ;;  %7456 = vmatprep.subr.mxu0 %v9407_v6  ;;  %v4833_v37 = vrot.slane %v4825_v17, %v8175_v4  ;;  %v4840_v51 = vrot.slane %v4826_v30, %v8175_v4 }
 0x7cd   : > { %v4841_v59 = vcombine.low %v4197_v42, %v4199_v10  ;;  %v4842_v39 = vcombine.high %v4197_v42, %v4199_v10  ;;  %v4192_v5 = vmul.f32 %v7699_v60, %v4184_v27  ;;  %7461 = vmatprep.subr.mxu1 %v9407_v6  ;;  %7454 = vmatmul.mubr.msk.f32.vlgmr.msra.gmra.mxu1 %vm392_vm2, %v4199_v10 }
 0x7ce   : > { %7449 = vmatmul.mubr.msk.f32.vlgmr.msra.gmra.mxu0 %vm392_vm2, %v4198_v18  ;;  %7462 = vmatpush3.xpose.msk.msra.mxu1 %vm392_vm2, %v8726_v34  ;;  %v4873_v14 = vcombine.low %v4817_v31, %v4833_v37  ;;  %v4874_v63 = vcombine.high %v4817_v31, %v4833_v37  ;;  %v4889_v8 = vcombine.low %v4824_v22, %v4840_v51  ;;  %v5451_v60 = vpop.permute.xlu0 %5450 }
 0x7cf   : > { %v4200_v52 = vmul.f32 %v8688_v32, %v4192_v5  ;;  %7457 = vmatpush3.msra.mxu0 %v8720_v12  ;;  %7458 = vmatprep.mubr.msk.f32.mxu0 %vm7825_vm1, %v9407_v6  ;;  %v4890_v32 = vcombine.high %v4824_v22, %v4840_v51  ;;  %v4849_v34 = vrot.slane %v4841_v59, %v8175_v4 }
 0x7d0   : > { %7463 = vmatprep.mubr.msk.f32.mxu1 %vm7825_vm1, %v9407_v6  ;;  %7466 = vmatprep.subr.mxu0 %v9407_v6  ;;  %v4856_v12 = vrot.slane %v4842_v39, %v8175_v4  ;;  %v8812_v57 = vrot.slane %v4874_v63, %v8244_v7  ;;  %v8831_v13 = vrot.slane %v4889_v8, %v8244_v7 }
 0x7d1   : > { %v4857_v15 = vcombine.low %v4198_v18, %v4200_v52  ;;  %v4858_v56 = vcombine.high %v4198_v18, %v4200_v52  ;;  %7471 = vmatprep.subr.mxu1 %v9407_v6  ;;  %7464 = vmatmul.mubr.msk.f32.vlgmr.msra.gmra.mxu1 %vm392_vm2, %v8730_v47  ;;  %v5371_v47 = vpop.permute.xlu1 %5370 }
 0x7d2   : > { %7459 = vmatmul.mubr.msk.f32.vlgmr.msra.gmra.mxu0 %vm392_vm2, %v4200_v52  ;;  %7472 = vmatpush3.xpose.msk.msra.mxu1 %vm392_vm2, %v8733_v62  ;;  %v5449_v37 = vpop.permute.xlu0 %5448 }
 0x7d3   : > { %v4865_v25 = vrot.slane %v4857_v15, %v8175_v4  ;;  %v4872_v33 = vrot.slane %v4858_v56, %v8175_v4  ;;  %7467 = vmatpush3.xpose.msk.msra.mxu0 %vm392_vm2, %v8724_v46  ;;  %7468 = vmatprep.mubr.msk.f32.mxu0 %vm7825_vm1, %v9407_v6  ;;  %v8809_v46 = vrot.slane %v4873_v14, %v8244_v7 }
 0x7d4   : > { %7473 = vmatprep.mubr.msk.f32.mxu1 %vm7825_vm1, %v9407_v6  ;;  %7476 = vmatprep.subr.mxu0 %v9407_v6 }
 0x7d5   : > { %7481 = vmatprep.subr.mxu1 %v9407_v6  ;;  %7474 = vmatmul.mubr.msk.f32.vlgmr.msra.gmra.mxu1 %vm392_vm2, %v8743_v38  ;;  %v4905_v62 = vcombine.low %v4849_v34, %v4865_v25  ;;  %v4906_v42 = vcombine.high %v4849_v34, %v4865_v25  ;;  %v4921_v49 = vcombine.low %v4856_v12, %v4872_v33  ;;  %v5529_v22 = vpop.permute.xlu1 %5528  ;;  %v388_v25 = vld [vmem:[%s9360_s3 + $0x18] sm:$0xff] }
 0x7d6   : > { %7469 = vmatmul.mubr.msk.f32.vlgmr.msra.gmra.mxu0 %vm392_vm2, %v8728_v21  ;;  %7482 = vmatpush3.xpose.msk.msra.mxu1 %vm392_vm2, %v5295_v3  ;;  %v4922_v53 = vcombine.high %v4856_v12, %v4872_v33 }
 0x7d7   : > { %7477 = vmatpush3.xpose.msk.msra.mxu0 %vm392_vm2, %v8741_v50  ;;  %7478 = vmatprep.mubr.msk.f32.mxu0 %vm7825_vm1, %v9407_v6  ;;  %v8819_v38 = vrot.slane %v4905_v62, %v8244_v7  ;;  %v8822_v21 = vrot.slane %v4906_v42, %v8244_v7  ;;  %v8825_v41 = vrot.slane %v4921_v49, %v8244_v7 }
 0x7d8   : > { %7483 = vmatprep.mubr.msk.f32.mxu1 %vm7825_vm1, %v9407_v6  ;;  %7486 = vmatprep.subr.mxu0 %v9407_v6  ;;  %v8834_v50 = vrot.slane %v4890_v32, %v8244_v7  ;;  %v8837_v17 = vrot.slane %v4922_v53, %v8244_v7 }
 0x7d9   : > { %7491 = vmatprep.subr.mxu1 %v9407_v6  ;;  %7484 = vmatmul.mubr.msk.f32.vlgmr.msra.gmra.mxu1 %vm392_vm2, %v5293_v43  ;;  %v4938_v30 = vcombine.high %v8809_v46, %v8819_v38  ;;  %v4939_v61 = vcombine.low %v8812_v57, %v8822_v21  ;;  %v4940_v3 = vcombine.high %v8812_v57, %v8822_v21  ;;  %v5527_v51 = vpop.permute.xlu1 %5526 }
 0x7da   : > { %7479 = vmatmul.mubr.msk.f32.vlgmr.msra.gmra.mxu0 %vm392_vm2, %v8756_v40  ;;  %7492 = vmatpush3.xpose.msk.msra.mxu1 %vm392_vm2, %v5451_v60  ;;  %v9438_v57 = vcombine.high %v8831_v13, %v8825_v41 }
 0x7db   : > { %7487 = vmatpush3.xpose.msk.msra.mxu0 %vm392_vm2, %v5373_v2  ;;  %7488 = vmatprep.mubr.msk.f32.mxu0 %vm7825_vm1, %v9407_v6 }
 0x7dc   : > { %7493 = vmatprep.mubr.msk.f32.mxu1 %vm7825_vm1, %v9407_v6  ;;  %7496 = vmatprep.subr.mxu0 %v9407_v6 }
 0x7dd   : > { %7494 = vmatmul.mubr.msk.f32.vlgmr.msra.gmra.mxu1 %vm392_vm2, %v5449_v37  ;;  %7501 = vmatprep.subr.mxu1 %v9407_v6 }
 0x7de   : > { %7489 = vmatmul.mubr.msk.f32.vlgmr.msra.gmra.mxu0 %vm392_vm2, %v5371_v47  ;;  %7503 = vmatprep.mubr.msk.f32.mxu1 %vm7825_vm1, %v9407_v6 }
 0x7df   : > { %7497 = vmatpush3.xpose.msk.msra.mxu0 %vm392_vm2, %v5529_v22  ;;  %7498 = vmatprep.mubr.msk.f32.mxu0 %vm7825_vm1, %v9407_v6 }
 0x7e0   : > { %7506 = vmatprep.subr.mxu0 %v9407_v6 }
 0x7e2   : > { %7499 = vmatmul.mubr.msk.f32.vlgmr.msra.gmra.mxu0 %vm392_vm2, %v5527_v51 }
 0x7e3   : > { %7508 = vmatprep.mubr.msk.f32.mxu0 %vm7825_vm1, %v9407_v6 }
 0x880   : > { %v8878_v59 = vpop.f32.mrf.mxu1 }
 0x882   : > { %v7425_v39 = vpop.f32.mrf.mxu1 }
 0x884   : > { %v8880_v5 = vpop.f32.mrf.mxu0 }
 0x885   : > { %v8882_v14 = vpop.f32.mrf.mxu1 }
 0x886   : > { %v7430_v63 = vpop.f32.mrf.mxu0 }
 0x887   : > { %v7435_v8 = vpop.f32.mrf.mxu1 }
 0x889   : > { %v8884_v52 = vpop.f32.mrf.mxu1 }
 0x88a   : > { %v8886_v2 = vpop.f32.mrf.mxu0 }
 0x88b   : > { %v7445_v43 = vpop.f32.mrf.mxu1 }
 0x88c   : > { %v7440_v15 = vpop.f32.mrf.mxu0 }
 0x88d   : > { %v8888_v56 = vpop.f32.mrf.mxu1 }
 0x88e   : > { %v8890_v32 = vpop.f32.mrf.mxu0 }
 0x88f   : > { %v7455_v34 = vpop.f32.mrf.mxu1 }
 0x890   : > { %v7450_v12 = vpop.f32.mrf.mxu0 }
 0x891   : > { %v5054_v33 = vpop.f32.mrf.mxu1 }
 0x892   : > { %v8895_v47 = vpop.f32.mrf.mxu0  ;;  %v5604_v62 = vmul.f32 0.35355338, %v5054_v33 }
 0x893   : > { %v7465_v42 = vpop.f32.mrf.mxu1 }
 0x894   : > { %v5612_v49 = vadd.f32 %v5604_v62, %v388_v25  ;;  %v7460_v60 = vpop.f32.mrf.mxu0 }
 0x895   : > { %v5210_v53 = vpop.f32.mrf.mxu1 }
 0x896   : > { %v5132_v22 = vpop.f32.mrf.mxu0  ;;  %v5606_v37 = vmul.f32 0.35355338, %v5210_v53  ;;  %v5620_v51 = vsel %vm392_vm2, %v5612_v49, -inf }
 0x897   : > { %v5605_v39 = vmul.f32 0.35355338, %v5132_v22  ;;  %5621 = vmax.xlane.f32.xlu0 %v5620_v51  ;;  %v7475_v63 = vpop.f32.mrf.mxu1 }
 0x898   : > { %v5614_v8 = vadd.f32 %v5606_v37, %v388_v25  ;;  %v7470_v43 = vpop.f32.mrf.mxu0 }
 0x899   : > { %v5613_v15 = vadd.f32 %v5605_v39, %v388_v25  ;;  %v5366_v34 = vpop.f32.mrf.mxu1 }
 0x89a   : > { %v5288_v12 = vpop.f32.mrf.mxu0  ;;  %v5608_v18 = vmul.f32 0.35355338, %v5366_v34  ;;  %v5626_v40 = vsel %vm392_vm2, %v5614_v8, -inf }
 0x89b   : > { %v5607_v33 = vmul.f32 0.35355338, %v5288_v12  ;;  %v5623_v62 = vsel %vm392_vm2, %v5613_v15, -inf  ;;  %5627 = vmax.xlane.f32.xlu0 %v5626_v40  ;;  %v7485_v42 = vpop.f32.mrf.mxu1 }
 0x89c   : > { %v5616_v60 = vadd.f32 %v5608_v18, %v388_v25  ;;  %5624 = vmax.xlane.f32.xlu1 %v5623_v62  ;;  %v7480_v53 = vpop.f32.mrf.mxu0 }
 0x89d   : > { %v5615_v31 = vadd.f32 %v5607_v33, %v388_v25  ;;  %v5522_v22 = vpop.f32.mrf.mxu1 }
 0x89e   : > { %v5444_v51 = vpop.f32.mrf.mxu0  ;;  %v5610_v63 = vmul.f32 0.35355338, %v5522_v22  ;;  %v5632_v37 = vsel %vm392_vm2, %v5616_v60, -inf }
 0x89f   : > { %v5609_v39 = vmul.f32 0.35355338, %v5444_v51  ;;  %v5629_v43 = vsel %vm392_vm2, %v5615_v31, -inf  ;;  %v7495_v34 = vpop.f32.mrf.mxu1 }
 0x8a0   : > { %v5618_v27 = vadd.f32 %v5610_v63, %v388_v25  ;;  %v7490_v10 = vpop.f32.mrf.mxu0  ;;  %5630 = vmax.xlane.f32.xlu0 %v5629_v43  ;;  %5633 = vmax.xlane.f32.xlu1 %v5632_v37 }
 0x8a1   : > { %v5617_v12 = vadd.f32 %v5609_v39, %v388_v25 }
 0x8a2   : > { %v5600_v40 = vpop.f32.mrf.mxu0  ;;  %v5638_v18 = vsel %vm392_vm2, %v5618_v27, -inf }
 0x8a3   : > { %v5611_v62 = vmul.f32 0.35355338, %v5600_v40  ;;  %v5635_v33 = vsel %vm392_vm2, %v5617_v12, -inf }
 0x8a4   : > { %v7500_v42 = vpop.f32.mrf.mxu0  ;;  %5636 = vmax.xlane.f32.xlu0 %v5635_v33  ;;  %5639 = vmax.xlane.f32.xlu1 %v5638_v18 }
 0x8a5   : > { %v5619_v53 = vadd.f32 %v5611_v62, %v388_v25 }
 0x8a7   : > { %v5641_v22 = vsel %vm392_vm2, %v5619_v53, -inf }
 0x8a8   : > { %5642 = vmax.xlane.f32.xlu0 %v5641_v22 }
 0x8b5   : > { %5732 = vrot.lane.b32.xlu1 %v7956_v16, %s7838_s8 }
 0x8b9   : > { %5884 = vrot.lane.b32.xlu1 %v7962_v20, %s7838_s8 }
 0x8bd   : > { %5960 = vrot.lane.b32.xlu1 %v7968_v23, %s7838_s8 }
 0x8be   : > { %5808 = vrot.lane.b32.xlu0 %v7960_v19, %s7838_s8 }
 0x920   : > { %v5622_v10 = vpop.xlane.xlu0 %5621 }
 0x921   : > { %v5644_v51 = vsub.f32 %v5612_v49, %v5622_v10 }
 0x923   : > { %v5652_v63 = vmul.f32 1.442695, %v5644_v51 }
 0x924   : > { %v5628_v25 = vpop.xlane.xlu0 %5627 }
 0x925   : > { %7700 = vpow2.f32 %v5652_v63  ;;  %v5625_v37 = vpop.xlane.xlu1 %5624  ;;  %v5646_v39 = vsub.f32 %v5614_v8, %v5628_v25 }
 0x926   : > { %v5645_v43 = vsub.f32 %v5613_v15, %v5625_v37 }
 0x927   : > { %v5656_v34 = vmul.f32 1.442695, %v5646_v39 }
 0x928   : > { %v5654_v40 = vmul.f32 1.442695, %v5645_v43 }
 0x929   : > { %7702 = vpow2.f32 %v5656_v34  ;;  %v5634_v16 = vpop.xlane.xlu1 %5633  ;;  %v5631_v18 = vpop.xlane.xlu0 %5630 }
 0x92a   : > { %7704 = vpow2.f32 %v5654_v40  ;;  %v5648_v20 = vsub.f32 %v5616_v60, %v5634_v16  ;;  %v5647_v62 = vsub.f32 %v5615_v31, %v5631_v18 }
 0x92c   : > { %v5660_v23 = vmul.f32 1.442695, %v5648_v20  ;;  %v5658_v33 = vmul.f32 1.442695, %v5647_v62 }
 0x92d   : > { %v5640_v42 = vpop.xlane.xlu1 %5639  ;;  %v5637_v19 = vpop.xlane.xlu0 %5636 }
 0x92e   : > { %7706 = vpow2.f32 %v5660_v23  ;;  %v5650_v49 = vsub.f32 %v5618_v27, %v5640_v42  ;;  %v5649_v22 = vsub.f32 %v5617_v12, %v5637_v19 }
 0x92f   : > { %7708 = vpow2.f32 %v5658_v33 }
 0x930   : > { %v5664_v10 = vmul.f32 1.442695, %v5650_v49  ;;  %v5662_v51 = vmul.f32 1.442695, %v5649_v22 }
 0x931   : > { %v5733_v8 = vpop.permute.xlu1 %5732  ;;  %v5643_v15 = vpop.xlane.xlu0 %5642 }
 0x932   : > { %v8913_v63 = vpop.eup %7700  ;;  %7710 = vpow2.f32 %v5664_v10  ;;  %v5651_v25 = vsub.f32 %v5619_v53, %v5643_v15  ;;  %7502 = vmatpush3.msra.mxu1 %v5733_v8 }
 0x933   : > { %7712 = vpow2.f32 %v5662_v51  ;;  %v5668_v31 = vsel %vm392_vm2, %v8913_v63, 0.0  ;;  %7511 = vmatprep.subr.mxu1 %v9407_v6 }
 0x934   : > { %v5666_v60 = vmul.f32 1.442695, %v5651_v25  ;;  %5669 = vadd.xlane.f32.xlu1 %v5668_v31 }
 0x935   : > { %v5809_v27 = vpop.permute.xlu0 %5808 }
 0x936   : > { %v8918_v12 = vpop.eup %7702  ;;  %7714 = vpow2.f32 %v5666_v60  ;;  %7507 = vmatpush3.msra.mxu0 %v5809_v27 }
 0x937   : > { %v8920_v37 = vpop.eup %7704  ;;  %v5674_v39 = vsel %vm392_vm2, %v8918_v12, 0.0  ;;  %7516 = vmatprep.subr.mxu0 %v9407_v6 }
 0x938   : > { %v5671_v53 = vsel %vm392_vm2, %v8920_v37, 0.0  ;;  %5675 = vadd.xlane.f32.xlu1 %v5674_v39 }
 0x939   : > { %5672 = vadd.xlane.f32.xlu0 %v5671_v53 }
 0x93b   : > { %v8927_v43 = vpop.eup %7706 }
 0x93c   : > { %v8929_v34 = vpop.eup %7708  ;;  %v5680_v40 = vsel %vm392_vm2, %v8927_v43, 0.0 }
 0x93d   : > { %5681 = vadd.xlane.f32.xlu1 %v5680_v40  ;;  %v5677_v16 = vsel %vm392_vm2, %v8929_v34, 0.0 }
 0x93e   : > { %5678 = vadd.xlane.f32.xlu0 %v5677_v16 }
 0x93f   : > { %v8935_v18 = vpop.eup %7710 }
 0x940   : > { %v8937_v20 = vpop.eup %7712  ;;  %v5686_v62 = vsel %vm392_vm2, %v8935_v18, 0.0 }
 0x941   : > { %5687 = vadd.xlane.f32.xlu1 %v5686_v62  ;;  %v5683_v23 = vsel %vm392_vm2, %v8937_v20, 0.0 }
 0x942   : > { %5684 = vadd.xlane.f32.xlu0 %v5683_v23 }
 0x943   : > { %v8943_v33 = vpop.eup %7714 }
 0x944   : > { %v5689_v42 = vsel %vm392_vm2, %v8943_v33, 0.0 }
 0x946   : > { %5690 = vadd.xlane.f32.xlu0 %v5689_v42 }
 0x952   : > { %6112 = vrot.lane.b32.xlu1 %v7974_v26, %s7838_s8  ;;  %v9413_v26 = vcombine.low %v8543_v11, %v8553_v55 }
 0x956   : > { %6264 = vrot.lane.b32.xlu1 %v7982_v29, %s7838_s8  ;;  %v9415_v29 = vld [vmem:[#allocation25_spill] sm:$0xff] }
 0x95a   : > { %6534 = vrot.lane.b32.xlu1 %v8607_v1, %s7839_s9  ;;  %v9416_v1 = vld [vmem:[#allocation24_spill] sm:$0xff] }
 0x95c   : > { %6036 = vrot.lane.b32.xlu0 %v7970_v24, %s7838_s8  ;;  %v9412_v24 = vcombine.high %v8540_v48, %v8550_v35 }
 0x95e   : > { %6538 = vrot.lane.b32.xlu1 %v8615_v54, %s7839_s9 }
 0x960   : > { %6188 = vrot.lane.b32.xlu0 %v7978_v28, %s7838_s8  ;;  %v9414_v28 = vcombine.high %v8543_v11, %v8553_v55 }
 0x962   : > { %6542 = vrot.lane.b32.xlu1 %v8617_v44, %s7839_s9 }
 0x964   : > { %6532 = vrot.lane.b32.xlu0 %v8609_v0, %s7839_s9  ;;  %v9417_v0 = vcombine.low %v9415_v29, %v9416_v1 }
 0x966   : > { %6546 = vrot.lane.b32.xlu1 %v8621_v9, %s7839_s9 }
 0x968   : > { %6536 = vrot.lane.b32.xlu0 %v8611_v45, %s7839_s9  ;;  %v5885_v45 = vpop.permute.xlu1 %5884 }
 0x96a   : > { %6566 = vrot.lane.b32.xlu1 %v8880_v5, %s7840_s10 }
 0x96c   : > { %6540 = vrot.lane.b32.xlu0 %v8613_v36, %s7839_s9  ;;  %v5961_v36 = vpop.permute.xlu1 %5960 }
 0x96e   : > { %6570 = vrot.lane.b32.xlu1 %v8886_v2, %s7840_s10 }
 0x970   : > { %6544 = vrot.lane.b32.xlu0 %v8619_v58, %s7839_s9 }
 0x972   : > { %6574 = vrot.lane.b32.xlu1 %v8890_v32, %s7840_s10 }
 0x974   : > { %6564 = vrot.lane.b32.xlu0 %v8878_v59, %s7840_s10 }
 0x976   : > { %6578 = vrot.lane.b32.xlu1 %v8895_v47, %s7840_s10 }
 0x978   : > { %6568 = vrot.lane.b32.xlu0 %v8882_v14, %s7840_s10 }
 0x97c   : > { %6572 = vrot.lane.b32.xlu0 %v8884_v52, %s7840_s10 }
 0x980   : > { %6576 = vrot.lane.b32.xlu0 %v8888_v56, %s7840_s10 }
 0x984   : > { %3415 = vrot.lane.b32.xlu0 %v9412_v24, %s7839_s9 }
 0x988   : > { %3419 = vrot.lane.b32.xlu0 %v9413_v26, %s7840_s10 }
 0x98c   : > { %3423 = vrot.lane.b32.xlu0 %v9414_v28, %s7841_s11 }
 0x990   : > { %3427 = vrot.lane.b32.xlu0 %v9417_v0, %s7842_s13 }
 0x9bd   : > { %v5670_v54 = vpop.xlane.xlu1 %5669 }
 0x9be   : > { %7716 = vrcp.f32 %v5670_v54 }
 0x9c1   : > { %v5676_v44 = vpop.xlane.xlu1 %5675 }
 0x9c2   : > { %7718 = vrcp.f32 %v5676_v44  ;;  %v5673_v58 = vpop.xlane.xlu0 %5672 }
 0x9c3   : > { %7720 = vrcp.f32 %v5673_v58 }
 0x9c6   : > { %v5682_v9 = vpop.xlane.xlu1 %5681 }
 0x9c7   : > { %7722 = vrcp.f32 %v5682_v9  ;;  %v5679_v59 = vpop.xlane.xlu0 %5678 }
 0x9c8   : > { %7724 = vrcp.f32 %v5679_v59 }
 0x9ca   : > { %v5688_v11 = vpop.xlane.xlu1 %5687 }
 0x9cb   : > { %v7717_v55 = vpop.eup %7716  ;;  %7726 = vrcp.f32 %v5688_v11  ;;  %v5685_v5 = vpop.xlane.xlu0 %5684 }
 0x9cc   : > { %v5700_v14 = vmul.f32 %v7717_v55, %v5670_v54  ;;  %7728 = vrcp.f32 %v5685_v5 }
 0x9ce   : > { %v5708_v52 = vsub.f32 2.0, %v5700_v14  ;;  %v6113_v54 = vpop.permute.xlu1 %6112 }
 0x9cf   : > { %v7719_v2 = vpop.eup %7718  ;;  %v5691_v56 = vpop.xlane.xlu0 %5690 }
 0x9d0   : > { %v7721_v32 = vpop.eup %7720  ;;  %v5716_v47 = vmul.f32 %v7717_v55, %v5708_v52  ;;  %v5702_v19 = vmul.f32 %v7719_v2, %v5676_v44  ;;  %7730 = vrcp.f32 %v5691_v56 }
 0x9d1   : > { %v5701_v49 = vmul.f32 %v7721_v32, %v5673_v58 }
 0x9d2   : > { %v9004_v22 = vmul.f32 %v8913_v63, %v5716_v47  ;;  %v5710_v10 = vsub.f32 2.0, %v5702_v19 }
 0x9d3   : > { %v5709_v51 = vsub.f32 2.0, %v5701_v49  ;;  %v6037_v62 = vpop.permute.xlu0 %6036 }
 0x9d4   : > { %v7723_v8 = vpop.eup %7722  ;;  %v5718_v15 = vmul.f32 %v7719_v2, %v5710_v10  ;;  %7504 = vmatmul.mubr.msk.f32.vlgmr.msra.gmra.mxu1 %vm392_vm2, %v9004_v22 }
 0x9d5   : > { %v7725_v25 = vpop.eup %7724  ;;  %v5717_v31 = vmul.f32 %v7721_v32, %v5709_v51  ;;  %v5704_v60 = vmul.f32 %v7723_v8, %v5682_v9  ;;  %7512 = vmatpush3.msra.mxu1 %v5885_v45  ;;  %7513 = vmatprep.mubr.msk.f32.mxu1 %vm7825_vm1, %v9407_v6 }
 0x9d6   : > { %v5726_v27 = vmul.f32 %v8918_v12, %v5718_v15  ;;  %v5703_v39 = vmul.f32 %v7725_v25, %v5679_v59  ;;  %7521 = vmatprep.subr.mxu1 %v9407_v6 }
 0x9d7   : > { %v5725_v63 = vmul.f32 %v8920_v37, %v5717_v31  ;;  %v5712_v53 = vsub.f32 2.0, %v5704_v60  ;;  %v6189_v59 = vpop.permute.xlu0 %6188 }
 0x9d8   : > { %v7727_v40 = vpop.eup %7726  ;;  %v5711_v16 = vsub.f32 2.0, %v5703_v39  ;;  %7514 = vmatmul.mubr.msk.f32.vlgmr.msra.gmra.mxu1 %vm392_vm2, %v5726_v27  ;;  %v6340_v52 = vcombine.low %v9004_v22, %v5726_v27 }
 0x9d9   : > { %v7729_v23 = vpop.eup %7728  ;;  %v5720_v42 = vmul.f32 %v7723_v8, %v5712_v53  ;;  %v5706_v24 = vmul.f32 %v7727_v40, %v5688_v11  ;;  %7509 = vmatmul.mubr.msk.f32.vlgmr.msra.gmra.mxu0 %vm392_vm2, %v5725_v63  ;;  %7522 = vmatpush3.msra.mxu1 %v6037_v62  ;;  %v6341_v11 = vcombine.high %v9004_v22, %v5726_v27 }
 0x9da   : > { %v5719_v26 = vmul.f32 %v7725_v25, %v5711_v16  ;;  %v5705_v28 = vmul.f32 %v7729_v23, %v5685_v5  ;;  %7517 = vmatpush3.msra.mxu0 %v5961_v36  ;;  %7518 = vmatprep.mubr.msk.f32.mxu0 %vm7825_vm1, %v9407_v6  ;;  %v6348_v22 = vrot.slane %v6340_v52, %v8175_v4 }
 0x9db   : > { %v5728_v12 = vmul.f32 %v8927_v43, %v5720_v42  ;;  %v5714_v0 = vsub.f32 2.0, %v5706_v24  ;;  %7523 = vmatprep.mubr.msk.f32.mxu1 %vm7825_vm1, %v9407_v6  ;;  %7526 = vmatprep.subr.mxu0 %v9407_v6 }
 0x9dc   : > { %v5727_v37 = vmul.f32 %v8929_v34, %v5719_v26  ;;  %v5713_v45 = vsub.f32 2.0, %v5705_v28  ;;  %7531 = vmatprep.subr.mxu1 %v9407_v6 }
 0x9dd   : > { %v7731_v44 = vpop.eup %7730  ;;  %v5722_v58 = vmul.f32 %v7727_v40, %v5714_v0  ;;  %7524 = vmatmul.mubr.msk.f32.vlgmr.msra.gmra.mxu1 %vm392_vm2, %v5728_v12 }
 0x9de   : > { %v6357_v43 = vcombine.high %v5725_v63, %v5727_v37  ;;  %v5721_v36 = vmul.f32 %v7729_v23, %v5713_v45  ;;  %v5707_v9 = vmul.f32 %v7731_v44, %v5691_v56  ;;  %7519 = vmatmul.mubr.msk.f32.vlgmr.msra.gmra.mxu0 %vm392_vm2, %v5727_v37  ;;  %v6356_v55 = vcombine.low %v5725_v63, %v5727_v37  ;;  %v6265_v56 = vpop.permute.xlu1 %6264 }
 0x9df   : > { %v5730_v34 = vmul.f32 %v8935_v18, %v5722_v58  ;;  %7527 = vmatpush3.msra.mxu0 %v6113_v54  ;;  %7532 = vmatpush3.msra.mxu1 %v6189_v59 }
 0x9e0   : > { %v5729_v5 = vmul.f32 %v8937_v20, %v5721_v36  ;;  %v5715_v14 = vsub.f32 2.0, %v5707_v9  ;;  %7528 = vmatprep.mubr.msk.f32.mxu0 %vm7825_vm1, %v9407_v6  ;;  %7533 = vmatprep.mubr.msk.f32.mxu1 %vm7825_vm1, %v9407_v6  ;;  %v6371_v2 = vrot.slane %v6357_v43, %v8175_v4  ;;  %v6355_v20 = vrot.slane %v6341_v11, %v8175_v4 }
 0x9e1   : > { %7536 = vmatprep.subr.mxu0 %v9407_v6  ;;  %7534 = vmatmul.mubr.msk.f32.vlgmr.msra.gmra.mxu1 %vm392_vm2, %v5730_v34  ;;  %v6364_v32 = vrot.slane %v6356_v55, %v8175_v4  ;;  %v6372_v47 = vcombine.low %v5728_v12, %v5730_v34  ;;  %v6373_v19 = vcombine.high %v5728_v12, %v5730_v34 }
 0x9e2   : > { %v5723_v18 = vmul.f32 %v7731_v44, %v5715_v14  ;;  %7529 = vmatmul.mubr.msk.f32.vlgmr.msra.gmra.mxu0 %vm392_vm2, %v5729_v5  ;;  %v6421_v10 = vcombine.high %v6355_v20, %v6371_v2  ;;  %v6420_v27 = vcombine.low %v6355_v20, %v6371_v2  ;;  %v6535_v21 = vpop.permute.xlu1 %6534 }
 0x9e3   : > { %7537 = vmatpush3.msra.mxu0 %v6265_v56  ;;  %7538 = vmatprep.mubr.msk.f32.mxu0 %vm7825_vm1, %v9407_v6  ;;  %v6404_v15 = vcombine.low %v6348_v22, %v6364_v32  ;;  %v6380_v25 = vrot.slane %v6372_v47, %v8175_v4  ;;  %v6387_v31 = vrot.slane %v6373_v19, %v8175_v4 }
 0x9e4   : > { %v5731_v49 = vmul.f32 %v8943_v33, %v5723_v18  ;;  %v6405_v62 = vcombine.high %v6348_v22, %v6364_v32  ;;  %v6428_v42 = vrot.slane %v6420_v27, %v8244_v7  ;;  %v6435_v24 = vrot.slane %v6421_v10, %v8244_v7  ;;  %v9419_v10 = vld [vmem:[#allocation26_spill] sm:$0xff] }
 0x9e5   : > { %v9049_v40 = vrot.slane %v6404_v15, %v8244_v7 }
 0x9e6   : > { %v6388_v51 = vcombine.low %v5729_v5, %v5731_v49  ;;  %v6389_v8 = vcombine.high %v5729_v5, %v5731_v49  ;;  %7539 = vmatmul.mubr.msk.f32.vlgmr.msra.gmra.mxu0 %vm392_vm2, %v5731_v49  ;;  %v6419_v54 = vrot.slane %v6405_v62, %v8244_v7  ;;  %v9418_v49 = vcombine.high %v9415_v29, %v9416_v1  ;;  %v9423_v29 = vld [vmem:[#allocation8_spill] sm:$0xff]  ;;  %v9424_v1 = vld [vmem:[#allocation11_spill] sm:$0xff] }
 0x9e7   : > { %v9435_v62 = vld [vmem:[#allocation15_spill] sm:$0xff] }
 0x9e8   : > { %v6396_v60 = vrot.slane %v6388_v51, %v8175_v4  ;;  %v6403_v6 = vrot.slane %v6389_v8, %v8175_v4  ;;  %v9420_v51 = vld [vmem:[#allocation27_spill] sm:$0xff] }
 0x9e9   : > { %v9421_v8 = vcombine.low %v9419_v10, %v9420_v51  ;;  %v9422_v15 = vcombine.high %v9419_v10, %v9420_v51  ;;  %v9443_v10 = vld [vmem:[#allocation17_spill] sm:$0xff] }
 0x9ea   : > { %v6436_v39 = vcombine.low %v6380_v25, %v6396_v60  ;;  %v6437_v63 = vcombine.high %v6380_v25, %v6396_v60  ;;  %v6452_v33 = vcombine.low %v6387_v31, %v6403_v6  ;;  %v6453_v53 = vcombine.high %v6387_v31, %v6403_v6  ;;  %v9426_v31 = vld [vmem:[#allocation9_spill] sm:$0xff]  ;;  %v9427_v60 = vld [vmem:[#allocation12_spill] sm:$0xff] }
 0x9eb   : > { %v9425_v25 = vcombine.high %v9423_v29, %v9424_v1  ;;  %v9428_v6 = vcombine.low %v9426_v31, %v9427_v60  ;;  %v9429_v27 = vcombine.high %v9426_v31, %v9427_v60  ;;  %v6621_v51 = vsel %vm392_vm2, %v9443_v10, %v6535_v21  ;;  %v9445_v31 = vld [vmem:[#allocation16_spill] sm:$0xff] }
 0x9ec   : > { %v9052_v16 = vrot.slane %v6436_v39, %v8244_v7  ;;  %v6460_v23 = vrot.slane %v6452_v33, %v8244_v7  ;;  %v6467_v26 = vrot.slane %v6453_v53, %v8244_v7  ;;  %v6451_v12 = vrot.slane %v6437_v63, %v8244_v7  ;;  %v9430_v39 = vld [vmem:[#allocation10_spill] sm:$0xff]  ;;  %v9431_v63 = vld [vmem:[#allocation13_spill] sm:$0xff] }
 0x9ed   : > { %v9432_v33 = vcombine.low %v9430_v39, %v9431_v63  ;;  %v9433_v53 = vcombine.high %v9430_v39, %v9431_v63 }
 0x9ee   : > { %v6469_v28 = vcombine.high %v9049_v40, %v9052_v16  ;;  %v6468_v0 = vcombine.low %v9049_v40, %v9052_v16  ;;  %v6473_v37 = vcombine.high %v6428_v42, %v6460_v23  ;;  %v6474_v45 = vcombine.low %v6435_v24, %v6467_v26 }
 0x9ef   : > { %v6475_v44 = vcombine.high %v6435_v24, %v6467_v26  ;;  %v6470_v58 = vcombine.low %v6419_v54, %v6451_v12  ;;  %v6471_v43 = vcombine.high %v6419_v54, %v6451_v12  ;;  %v6472_v36 = vcombine.low %v6428_v42, %v6460_v23  ;;  %v9436_v23 = vld [vmem:[#allocation14_spill] sm:$0xff]  ;;  %v6539_v12 = vpop.permute.xlu1 %6538 }
 0x9f0   : > { %6477 = vrot.lane.b32.xlu1 %v6469_v28, %s7839_s9  ;;  %v9437_v42 = vcombine.low %v9435_v62, %v9436_v23  ;;  %v9440_v26 = vcombine.low %v8834_v50, %v8837_v17 }
 0x9f4   : > { %6481 = vrot.lane.b32.xlu1 %v6470_v58, %s7840_s10 }
 0x9f8   : > { %6485 = vrot.lane.b32.xlu1 %v6471_v43, %s7841_s11 }
 0x9fc   : > { %6489 = vrot.lane.b32.xlu1 %v6472_v36, %s7842_s13 }
 0xa94   : > { %v5804_v9 = vpop.f32.mrf.mxu1 }
 0xa95   : > { %6596 = vrot.lane.b32.xlu0 %v5804_v9, %s7841_s11 }
 0xa96   : > { %v7505_v59 = vpop.f32.mrf.mxu1 }
 0xa98   : > { %v5956_v11 = vpop.f32.mrf.mxu1 }
 0xa99   : > { %v5880_v55 = vpop.f32.mrf.mxu0  ;;  %6600 = vrot.lane.b32.xlu0 %v5956_v11, %s7841_s11 }
 0xa9a   : > { %6598 = vrot.lane.b32.xlu1 %v5880_v55, %s7841_s11  ;;  %v7515_v34 = vpop.f32.mrf.mxu1 }
 0xa9b   : > { %v7510_v5 = vpop.f32.mrf.mxu0 }
 0xa9d   : > { %v6108_v14 = vpop.f32.mrf.mxu1 }
 0xa9e   : > { %v6032_v52 = vpop.f32.mrf.mxu0  ;;  %6604 = vrot.lane.b32.xlu0 %v6108_v14, %s7841_s11 }
 0xa9f   : > { %6602 = vrot.lane.b32.xlu1 %v6032_v52, %s7841_s11  ;;  %v7525_v2 = vpop.f32.mrf.mxu1 }
 0xaa0   : > { %v7520_v18 = vpop.f32.mrf.mxu0 }
 0xaa1   : > { %v6260_v56 = vpop.f32.mrf.mxu1 }
 0xaa2   : > { %v6184_v20 = vpop.f32.mrf.mxu0  ;;  %6608 = vrot.lane.b32.xlu0 %v6260_v56, %s7841_s11 }
 0xaa3   : > { %6606 = vrot.lane.b32.xlu1 %v6184_v20, %s7841_s11  ;;  %v7535_v32 = vpop.f32.mrf.mxu1 }
 0xaa4   : > { %v7530_v47 = vpop.f32.mrf.mxu0 }
 0xaa5   : > { %v9442_v47 = vld [vmem:[#allocation19_spill] sm:$0xff] }
 0xaa6   : > { %v6336_v19 = vpop.f32.mrf.mxu0  ;;  %3431 = vrot.lane.b32.xlu0 %v9418_v49, %s7838_s8 }
 0xaa7   : > { %6610 = vrot.lane.b32.xlu1 %v6336_v19, %s7841_s11  ;;  %v6623_v19 = vsel %vm392_vm2, %v9442_v47, %v6539_v12  ;;  %v9450_v47 = vcombine.low %v8540_v48, %v8550_v35 }
 0xaa8   : > { %v7540_v22 = vpop.f32.mrf.mxu0 }
 0xaaa   : > { %3435 = vrot.lane.b32.xlu0 %v9421_v8, %s7835_s17  ;;  %v9444_v8 = vld [vmem:[#allocation18_spill] sm:$0xff] }
 0xaab   : > { %6493 = vrot.lane.b32.xlu1 %v6473_v37, %s7838_s8  ;;  %v9441_v37 = vcombine.high %v8834_v50, %v8837_v17 }
 0xaae   : > { %3439 = vrot.lane.b32.xlu0 %v9422_v15, %s7832_s12 }
 0xaaf   : > { %6497 = vrot.lane.b32.xlu1 %v6474_v45, %s7835_s17 }
 0xab2   : > { %1879 = vrot.lane.b32.xlu0 %v9425_v25, %s7839_s9 }
 0xab3   : > { %6501 = vrot.lane.b32.xlu1 %v6475_v44, %s7832_s12 }
 0xab6   : > { %1883 = vrot.lane.b32.xlu0 %v9428_v6, %s7840_s10 }
 0xab7   : > { %4946 = vrot.lane.b32.xlu1 %v4938_v30, %s7839_s9  ;;  %v6533_v30 = vpop.permute.xlu0 %6532 }
 0xab8   : > { %v6620_v60 = vsel %vm392_vm2, %v9445_v31, %v6533_v30 }
 0xaba   : > { %1887 = vrot.lane.b32.xlu0 %v9429_v27, %s7841_s11  ;;  %v9446_v27 = vld [vmem:[#allocation23_spill] sm:$0xff] }
 0xabb   : > { %4950 = vrot.lane.b32.xlu1 %v4939_v61, %s7840_s10  ;;  %v9434_v61 = vcombine.low %v8831_v13, %v8825_v41  ;;  %v6537_v24 = vpop.permute.xlu0 %6536  ;;  %v6543_v13 = vpop.permute.xlu1 %6542 }
 0xabc   : > { %v6622_v15 = vsel %vm392_vm2, %v9444_v8, %v6537_v24 }
 0xabe   : > { %1891 = vrot.lane.b32.xlu0 %v9432_v33, %s7842_s13 }
 0xabf   : > { %4954 = vrot.lane.b32.xlu1 %v4940_v3, %s7841_s11  ;;  %v9439_v3 = vcombine.high %v9435_v62, %v9436_v23  ;;  %v6541_v28 = vpop.permute.xlu0 %6540  ;;  %v6547_v54 = vpop.permute.xlu1 %6546 }
 0xac2   : > { %1895 = vrot.lane.b32.xlu0 %v9433_v53, %s7838_s8  ;;  %v9447_v53 = vld [vmem:[#allocation22_spill] sm:$0xff] }
 0xac3   : > { %4958 = vrot.lane.b32.xlu1 %v9434_v61, %s7842_s13  ;;  %v6545_v41 = vpop.permute.xlu0 %6544  ;;  %v6567_v58 = vpop.permute.xlu1 %6566  ;;  %v6624_v61 = vsel %vm392_vm2, %v9447_v53, %v6541_v28 }
 0xac4   : > { %v6629_v6 = vsel %vm1907_vm3, %v6621_v51, %v6567_v58  ;;  %v6626_v39 = vsel %vm392_vm2, %v9446_v27, %v6545_v41 }
 0xac6   : > { %1899 = vrot.lane.b32.xlu0 %v9437_v42, %s7835_s17 }
 0xac7   : > { %4962 = vrot.lane.b32.xlu1 %v9438_v57, %s7838_s8  ;;  %v6565_v45 = vpop.permute.xlu0 %6564  ;;  %v6571_v36 = vpop.permute.xlu1 %6570  ;;  %s7736_s8 = sshll.u32 %s7843_s6, 4  ;;  %s7737_s8 = int_to_ptr.vmem [resolvable:$false] %s7736_s8 }
 0xac8   : > { %v6631_v22 = vsel %vm1907_vm3, %v6623_v19, %v6571_v36  ;;  %v6628_v30 = vsel %vm1907_vm3, %v6620_v60, %v6565_v45  ;;  %s7738_s9 = scalar_lea.vmem %s7737_s8, 512 }
 0xaca   : > { %1903 = vrot.lane.b32.xlu0 %v9439_v3, %s7832_s12 }
 0xacb   : > { %4966 = vrot.lane.b32.xlu1 %v9440_v26, %s7835_s17  ;;  %v6569_v44 = vpop.permute.xlu0 %6568  ;;  %v6575_v59 = vpop.permute.xlu1 %6574  ;;  %v9448_v26 = vld [vmem:[#allocation20_spill] sm:$0xff] }
 0xacc   : > { %v6630_v63 = vsel %vm1907_vm3, %v6622_v15, %v6569_v44  ;;  %v6625_v12 = vsel %vm392_vm2, %v9448_v26, %v6543_v13 }
 0xacd   : > { %v6633_v58 = vsel %vm1907_vm3, %v6625_v12, %v6575_v59 }
 0xacf   : > { %4970 = vrot.lane.b32.xlu1 %v9441_v37, %s7832_s12  ;;  %v6573_v43 = vpop.permute.xlu0 %6572  ;;  %v6579_v55 = vpop.permute.xlu1 %6578  ;;  %v9449_v37 = vld [vmem:[#allocation21_spill] sm:$0xff]  ;;  %s7059_s12 = sshll.u32 %s7896_s22, 8 }
 0xad0   : > { %v6627_v41 = vsel %vm392_vm2, %v9449_v37, %v6547_v54  ;;  %v6632_v28 = vsel %vm1907_vm3, %v6624_v61, %v6573_v43  ;;  %s9284_s23 = scalar_lea.hbm %s9362_s5, %s7059_s12 }
 0xad3   : > { %v6577_v9 = vpop.permute.xlu0 %6576  ;;  %v9147_v34 = vpop.permute.xlu1 %6477 }
 0xad4   : > { %v6634_v62 = vsel %vm1907_vm3, %v6626_v39, %v6577_v9 }
 0xad7   : > { %v3416_v11 = vpop.permute.xlu0 %3415  ;;  %v9149_v14 = vpop.permute.xlu1 %6481 }
 0xad8   : > { %v3442_v13 = vsel %vm392_vm2, %v9450_v47, %v3416_v11 }
 0xadb   : > { %v3420_v5 = vpop.permute.xlu0 %3419  ;;  %v9151_v50 = vpop.permute.xlu1 %6485 }
 0xadf   : > { %v3424_v52 = vpop.permute.xlu0 %3423  ;;  %v9153_v18 = vpop.permute.xlu1 %6489 }
 0xae3   : > { %v3428_v17 = vpop.permute.xlu0 %3427 }
 0xb07   : > { %v6597_v2 = vpop.permute.xlu0 %6596 }
 0xb08   : > { %v6636_v44 = vsel %vm1909_vm4, %v6628_v30, %v6597_v2 }
 0xb0b   : > { %v6601_v56 = vpop.permute.xlu0 %6600 }
 0xb0c   : > { %v6599_v20 = vpop.permute.xlu1 %6598  ;;  %v6638_v42 = vsel %vm1909_vm4, %v6630_v63, %v6601_v56 }
 0xb0d   : > { %v6637_v23 = vsel %vm1909_vm4, %v6629_v6, %v6599_v20  ;;  %v6644_v36 = vcombine.low %v6636_v44, %v6638_v42  ;;  %v6645_v9 = vcombine.high %v6636_v44, %v6638_v42  ;;  %v6635_v20 = vsel %vm1907_vm3, %v6627_v41, %v6579_v55 }
 0xb0f   : > { %v6652_v48 = vrot.slane %v6644_v36, %v8175_v4  ;;  %v6659_v35 = vrot.slane %v6645_v9, %v8175_v4 }
 0xb10   : > { %v6605_v32 = vpop.permute.xlu0 %6604 }
 0xb11   : > { %v6603_v49 = vpop.permute.xlu1 %6602  ;;  %v6640_v45 = vsel %vm1909_vm4, %v6632_v28, %v6605_v32  ;;  %v3443_v32 = vsel %vm1907_vm3, %v3442_v13, %v3420_v5 }
 0xb12   : > { %v6639_v25 = vsel %vm1909_vm4, %v6631_v22, %v6603_v49  ;;  %v3444_v51 = vsel %vm1909_vm4, %v3443_v32, %v3424_v52  ;;  %v6504_v52 = vsel %vm392_vm2, %v6468_v0, %v9147_v34 }
 0xb13   : > { %v6660_v57 = vcombine.low %v6637_v23, %v6639_v25  ;;  %v6661_v21 = vcombine.high %v6637_v23, %v6639_v25  ;;  %v3445_v5 = vsel %vm255_vm0, %v3444_v51, %v3428_v17 }
 0xb14   : > { %v6609_v33 = vpop.permute.xlu0 %6608 }
 0xb15   : > { %v6607_v24 = vpop.permute.xlu1 %6606  ;;  %v6642_v3 = vsel %vm1909_vm4, %v6634_v62, %v6609_v33  ;;  %v6668_v43 = vrot.slane %v6660_v57, %v8175_v4  ;;  %v6675_v2 = vrot.slane %v6661_v21, %v8175_v4  ;;  %v6505_v33 = vsel %vm1907_vm3, %v6504_v52, %v9149_v14 }
 0xb16   : > { %v6676_v19 = vcombine.low %v6640_v45, %v6642_v3  ;;  %v6677_v54 = vcombine.high %v6640_v45, %v6642_v3  ;;  %v6641_v59 = vsel %vm1909_vm4, %v6633_v58, %v6607_v24  ;;  %v6506_v0 = vsel %vm1909_vm4, %v6505_v33, %v9151_v50 }
 0xb17   : > { %v6708_v6 = vcombine.low %v6652_v48, %v6668_v43  ;;  %v6724_v27 = vcombine.low %v6659_v35, %v6675_v2  ;;  %v6507_v42 = vsel %vm255_vm0, %v6506_v0, %v9153_v18  ;;  %v6709_v24 = vcombine.high %v6652_v48, %v6668_v43 }
 0xb18   : > { %v3432_v56 = vpop.permute.xlu0 %3431  ;;  %v6684_v8 = vrot.slane %v6676_v19, %v8175_v4  ;;  %v6691_v15 = vrot.slane %v6677_v54, %v8175_v4  ;;  %v6725_v44 = vcombine.high %v6659_v35, %v6675_v2  ;;  %v9451_v43 = vcombine.low %v9423_v29, %v9424_v1 }
 0xb19   : > { %v6611_v49 = vpop.permute.xlu1 %6610  ;;  %v9220_v34 = vrot.slane %v6708_v6, %v8244_v7  ;;  %v9223_v14 = vrot.slane %v6724_v27, %v8244_v7  ;;  %v6723_v28 = vrot.slane %v6709_v24, %v8244_v7  ;;  %v9452_v29 = vcombine.low %v8809_v46, %v8819_v38 }
 0xb1a   : > { %v6643_v22 = vsel %vm1909_vm4, %v6635_v20, %v6611_v49  ;;  %v6739_v20 = vrot.slane %v6725_v44, %v8244_v7 }
 0xb1b   : > { %v6692_v10 = vcombine.low %v6641_v59, %v6643_v22  ;;  %v6693_v55 = vcombine.high %v6641_v59, %v6643_v22 }
 0xb1c   : > { %v3436_v11 = vpop.permute.xlu0 %3435 }
 0xb1d   : > { %v6700_v25 = vrot.slane %v6692_v10, %v8175_v4  ;;  %v6707_v31 = vrot.slane %v6693_v55, %v8175_v4  ;;  %v6494_v60 = vpop.permute.xlu1 %6493  ;;  %v3446_v4 = vsel %vm1912_vm5, %v3445_v5, %v3432_v56 }
 0xb1e   : > { %v3447_v40 = vsel %vm1914_vm6, %v3446_v4, %v3436_v11  ;;  %v6508_v30 = vsel %vm1912_vm5, %v6507_v42, %v6494_v60 }
 0xb1f   : > { %v6740_v39 = vcombine.low %v6684_v8, %v6700_v25  ;;  %v6756_v63 = vcombine.low %v6691_v15, %v6707_v31  ;;  %v6741_v61 = vcombine.high %v6684_v8, %v6700_v25  ;;  %v6757_v26 = vcombine.high %v6691_v15, %v6707_v31 }
 0xb20   : > { %v3440_v53 = vpop.permute.xlu0 %3439 }
 0xb21   : > { %v9211_v17 = vrot.slane %v6740_v39, %v8244_v7  ;;  %v9214_v62 = vrot.slane %v6756_v63, %v8244_v7  ;;  %v6498_v16 = vpop.permute.xlu1 %6497  ;;  %v3448_v23 = vsel %vm1916_vm7, %v3447_v40, %v3440_v53  ;;  %v6755_v3 = vrot.slane %v6741_v61, %v8244_v7 }
 0xb22   : > { %6512 = vrot.lane.b32.xlu0 %v3448_v23, %s7827_s7  ;;  %v6509_v12 = vsel %vm1914_vm6, %v6508_v30, %v6498_v16  ;;  %v6771_v36 = vrot.slane %v6757_v26, %v8244_v7 }
 0xb23   : > { %v6772_v50 = vcombine.low %v9220_v34, %v9211_v17  ;;  %v6776_v21 = vcombine.low %v9223_v14, %v9214_v62  ;;  %v6773_v18 = vcombine.high %v9220_v34, %v9211_v17  ;;  %v6777_v45 = vcombine.high %v9223_v14, %v9214_v62 }
 0xb24   : > { %v1880_v57 = vpop.permute.xlu0 %1879  ;;  %v6774_v56 = vcombine.low %v6723_v28, %v6755_v3  ;;  %v6778_v19 = vcombine.low %v6739_v20, %v6771_v36  ;;  %v6775_v54 = vcombine.high %v6723_v28, %v6755_v3  ;;  %v6779_v7 = vcombine.high %v6739_v20, %v6771_v36 }
 0xb25   : > { %v6502_v37 = vpop.permute.xlu1 %6501  ;;  %v1906_v2 = vsel %vm392_vm2, %v9451_v43, %v1880_v57 }
 0xb26   : > { %v6510_v41 = vsel %vm1916_vm7, %v6509_v12, %v6502_v37  ;;  %6781 = vrot.lane.b32.xlu0 %v6773_v18, %s7842_s13 }
 0xb27   : > { %6516 = vrot.lane.b32.xlu1 %v6510_v41, %s7827_s7 }
 0xb28   : > { %v1884_v58 = vpop.permute.xlu0 %1883 }
 0xb29   : > { %v4947_v9 = vpop.permute.xlu1 %4946  ;;  %v1908_v22 = vsel %vm1907_vm3, %v1906_v2, %v1884_v58 }
 0xb2a   : > { %6785 = vrot.lane.b32.xlu0 %v6774_v56, %s7827_s7  ;;  %v4973_v1 = vsel %vm392_vm2, %v9452_v29, %v4947_v9 }
 0xb2b   : > { %6793 = vrot.lane.b32.xlu1 %v6777_v45, %s7842_s13 }
 0xb2c   : > { %v1888_v47 = vpop.permute.xlu0 %1887 }
 0xb2d   : > { %v4951_v13 = vpop.permute.xlu1 %4950  ;;  %v1910_v32 = vsel %vm1909_vm4, %v1908_v22, %v1888_v47 }
 0xb2e   : > { %6789 = vrot.lane.b32.xlu0 %v6775_v54, %s7826_s26  ;;  %v4974_v35 = vsel %vm1907_vm3, %v4973_v1, %v4951_v13 }
 0xb2f   : > { %6797 = vrot.lane.b32.xlu1 %v6778_v19, %s7827_s7 }
 0xb30   : > { %v1892_v49 = vpop.permute.xlu0 %1891 }
 0xb31   : > { %v4955_v59 = vpop.permute.xlu1 %4954  ;;  %v1911_v10 = vsel %vm255_vm0, %v1910_v32, %v1892_v49 }
 0xb32   : > { %v4975_v11 = vsel %vm1909_vm4, %v4974_v35, %v4955_v59 }
 0xb33   : > { %6801 = vrot.lane.b32.xlu1 %v6779_v7, %s7826_s26  ;;  %s9272_s26 = sand.u32 1, %s7814_s19  }
 0xb34   : > { %v1896_v55 = vpop.permute.xlu0 %1895  ;;  %s6942_s7 = sshll.u32 %s9272_s26, 4  ;;  %s6819_s25 = scalar_lea.sflag [#allocation5], %s9272_s26 }
 0xb35   : > { %v4959_v51 = vpop.permute.xlu1 %4958  ;;  %v1913_v48 = vsel %vm1912_vm5, %v1911_v10, %v1896_v55  ;;  %s229_s14 = scalar_lea.vmem [#allocation4], %s6942_s7 }
 0xb36   : > { %v4976_v15 = vsel %vm255_vm0, %v4975_v11, %v4959_v51  ;;  %s6847_s15 = sshll.u32 %s229_s14, 4  ;;  %s6848_s15 = int_to_ptr.vmem [resolvable:$true] %s6847_s15 }
 0xb37   : > { %s7732_s30 = scalar_lea.vmem %s6848_s15, 256  ;;  %p7739_p0 = scmp.lt.s32.totalorder %s6848_s15, %s7737_s8 }
 0xb38   : > { %v1900_v8 = vpop.permute.xlu0 %1899  ;;  %p7733_p11 = scmp.ne.s32.totalorder %s6848_s15, %s7732_s30  ;;  %p7740_p1 = scmp.lt.s32.totalorder %s7738_s9, %s7732_s30 }
 0xb39   : > { %v4963_v25 = vpop.permute.xlu1 %4962  ;;  %v1915_v31 = vsel %vm1914_vm6, %v1913_v48, %v1900_v8 }
 0xb3a   : > { %v4977_v60 = vsel %vm1912_vm5, %v4976_v15, %v4963_v25  ;;  %p7734_p12 = pnand %p7733_p11, %p7913_p5  ;;  %p7741_p2 = por %p7740_p1, %p7739_p0 }
 0xb3c   : > { %v1904_v5 = vpop.permute.xlu0 %1903  ;;  %p7735_p13 = pneg %p7734_p12 }
 0xb3d   : > { %v4967_v6 = vpop.permute.xlu1 %4966  ;;  %v1917_v46 = vsel %vm1916_vm7, %v1915_v31, %v1904_v5 }
 0xb3e   : > { %v4978_v38 = vsel %vm1914_vm6, %v4977_v60, %v4967_v6  ;;  %p7742_p3 = pnand %p7741_p2, %p7735_p13 }
 0xb41   : > { %v4971_v27 = vpop.permute.xlu1 %4970 }
 0xb42   : > { %v4979_v52 = vsel %vm1916_vm7, %v4978_v38, %v4971_v27 }
 0xb94   : > { %v6513_v39 = vpop.permute.xlu0 %6512 }
 0xb95   : > { %v6520_v63 = vsel %vm6519_vm8, %v1917_v46, %v6513_v39 }
 0xb96   : > { %6522 = vst [vmem:[%s229_s14] sm:$0xff] %v6520_v63 }
 0xb98   : > { %v6782_v4 = vpop.permute.xlu0 %6781 }
 0xb99   : > { %v6517_v33 = vpop.permute.xlu1 %6516 }
 0xb9a   : > { %v6521_v53 = vsel %vm6519_vm8, %v4979_v52, %v6517_v33 }
 0xb9b   : > { %6523 = vst [vmem:[%s229_s14 + $0x8] sm:$0xff] %v6521_v53 }
 0xb9c   : > { %7745 = shalt.err (!%p7742_p3)
}
 0xb9d   : > { %s7746_s10 = scalar_lea.hbm %s9284_s23, 256  ;;  %s7750_s14 = scalar_lea.hbm %s9362_s5, 512 }
 0xb9e   : > { %p7747_p4 = scmp.ne.s32.totalorder %s9284_s23, %s7746_s10  ;;  %p7751_p9 = scmp.lt.s32.totalorder %s9284_s23, %s9362_s5 }
 0xb9f   : > { %p7752_p10 = scmp.lt.s32.totalorder %s7750_s14, %s7746_s10 }
 0xba0   : > { %p7748_p7 = pnand %p7747_p4, %p7913_p5 }
 0xba1   : > { %p7753_p11 = por %p7752_p10, %p7751_p9 }
 0xba2   : > { %p7749_p8 = pneg %p7748_p7 }
 0xba4   : > { %p7754_p12 = pnand %p7753_p11, %p7749_p8 }
 0xba6   : > { %7757 = shalt.err (!%p7754_p12)
}
 0xba7   : > { %7542 = dma.vmem_to_hbm [thread:$0]  (%p7913_p5), %s6848_s15, 256, %s9284_s23, %s6819_s25   ;;  %v6794_v61 = vpop.permute.xlu1 %6793  ;;  %v6786_v40 = vpop.permute.xlu0 %6785  ;;  %vm6806_vm9 = vcmask 785408   ;;  %v6804_v16 = vsel %vm255_vm0, %v6772_v50, %v6782_v4 }
 0xba8   : > { %v6805_v0 = vsel %vm6519_vm8, %v6804_v16, %v6786_v40  ;;  %s222_s30 = scalar_lea.vmem [#allocation2], %s6942_s7  ;;  %v6808_v30 = vsel %vm255_vm0, %v6776_v21, %v6794_v61  ;;  %s9321_s25 = scalar_lea.hbm %s9361_s4, %s7059_s12 }
 0xba9   : > { %s6833_s6 = sshll.u32 %s222_s30, 4  ;;  %s6814_s7 = scalar_lea.sflag [#allocation3], %s9272_s26  ;;  %s6834_s6 = int_to_ptr.vmem [resolvable:$true] %s6833_s6 }
 0xbaa   : > { %s7758_s8 = scalar_lea.vmem %s6834_s6, 256  ;;  %s7844_s9 = smov [#allocation2]  }
 0xbab   : > { %v6798_v23 = vpop.permute.xlu1 %6797  ;;  %v6790_v42 = vpop.permute.xlu0 %6789  ;;  %p7759_p13 = scmp.ne.s32.totalorder %s6834_s6, %s7758_s8  ;;  %s7762_s10 = sshll.u32 %s7844_s9, 4  ;;  %s7763_s10 = int_to_ptr.vmem [resolvable:$false] %s7762_s10 }
 0xbac   : > { %v6807_v24 = vsel %vm6806_vm9, %v6805_v0, %v6790_v42  ;;  %v6809_v17 = vsel %vm6519_vm8, %v6808_v30, %v6798_v23  ;;  %s7764_s11 = scalar_lea.vmem %s7763_s10, 512  ;;  %p7765_p2 = scmp.lt.s32.totalorder %s6834_s6, %s7763_s10 }
 0xbad   : > { %6811 = vst [vmem:[%s222_s30] sm:$0xff] %v6807_v24  ;;  %p7760_p0 = pnand %p7759_p13, %p7913_p5  ;;  %p7766_p3 = scmp.lt.s32.totalorder %s7764_s11, %s7758_s8 }
 0xbaf   : > { %v6802_v34 = vpop.permute.xlu1 %6801  ;;  %p7761_p1 = pneg %p7760_p0  ;;  %p7767_p4 = por %p7766_p3, %p7765_p2 }
 0xbb0   : > { %v6810_v57 = vsel %vm6806_vm9, %v6809_v17, %v6802_v34 }
 0xbb1   : > { %6812 = vst [vmem:[%s222_s30 + $0x8] sm:$0xff] %v6810_v57  ;;  %p7768_p7 = pnand %p7767_p4, %p7761_p1 }
 0xbb3   : > { %7771 = shalt.err (!%p7768_p7)
}
 0xbb4   : > { %s7772_s22 = scalar_lea.hbm %s9321_s25, 256  ;;  %s7776_s13 = scalar_lea.hbm %s9361_s4, 512 }
 0xbb5   : > { %p7773_p8 = scmp.ne.s32.totalorder %s9321_s25, %s7772_s22  ;;  %p7777_p11 = scmp.lt.s32.totalorder %s9321_s25, %s9361_s4 }
 0xbb6   : > { %p7778_p12 = scmp.lt.s32.totalorder %s7776_s13, %s7772_s22 }
 0xbb7   : > { %p7774_p9 = pnand %p7773_p8, %p7913_p5 }
 0xbb8   : > { %p7779_p13 = por %p7778_p12, %p7777_p11 }
 0xbb9   : > { %p7775_p10 = pneg %p7774_p9 }
 0xbbb   : > { %p7780_p0 = pnand %p7779_p13, %p7775_p10 }
 0xbbd   : > { %7783 = shalt.err (!%p7780_p0)
}
 0xbbe   : > { %7541 = dma.vmem_to_hbm [thread:$0]  (%p7913_p5), %s6834_s6, 256, %s9321_s25, %s6814_s7  }
 0xbbf PF: > { %p7552_p1 = scmp.ge.s32.totalorder %s7822_s21, 2  ;;  %s6859_s17 = sand.u32 1, %s7810_s18  }
 0xbc0   : > { %s6860_s30 = scalar_lea.sflag [#allocation3], %s6859_s17 }
 0xbc1   : > { %p7546_p2 = pnand %p7552_p1, %p7917_p6 }
 0xbc3   : > { %p7547_p3 = pneg %p7546_p2 }
 0xbc5   : > { %7801 = dma.done.wait (%p7547_p3), %s6860_s30, 256  }
 0xbc6   : > { %7803 = vsyncadd (%p7547_p3), %s6860_s30, 4294967040  ;;  %s6869_s15 = scalar_lea.sflag [#allocation5], %s6859_s17 }
 0xbc7   : > { %7805 = dma.done.wait (%p7547_p3), %s6869_s15, 256  }
 0xbc8   : > { %7807 = vsyncadd (%p7547_p3), %s6869_s15, 4294967040  ;;  %p19_p5 = scmp.ge.s32.totalorder %s7900_s24, 4   ;;  %s9453_s18 = smov %s7814_s19 }
 0xbc9   : > { %s9454_s19 = smov %s7818_s20  ;;  %s9455_s20 = smov %s7911_s27 }
 0xbca   : > { %s9456_s21 = smov %s7900_s24  ;;  %21 = sbr.rel (!%p19_p5) target bundleno = 5 (0x5), region = 88 }
 0xbcf   :  { %6874 = vsyncpa [#allocation3], 1 }
 0xbd0   :  { %6876 = vsyncpa [#allocation3 + $0x1], 1 }
 0xbd1   :  { %6877 = vsyncpa [#allocation5], 1 }
 0xbd2   :  { %6879 = vsyncpa [#allocation5 + $0x1], 1 }

</bundles_post_ra>
